<compile_context>
chip_gen: v5e
topology: v5e:2x2
jax: 0.10.0
libtpu: 0.0.40
codegen_flags: <defaults>
</compile_context>

<pallas_src>
import functools

import jax
import jax.numpy as jnp
from jax import lax
from jax.experimental import pallas as pl
from jax.experimental.pallas import tpu as pltpu

_VMEM_LIMIT = 32 * 1024 * 1024  # weights + activations here are <1 MiB; safe on v5e/v6e/v7x


def _layernorm(x, g, b, eps=1e-5):
    mu = jnp.mean(x, axis=-1, keepdims=True)
    var = jnp.mean(jnp.square(x - mu), axis=-1, keepdims=True)
    return (x - mu) * lax.rsqrt(var + eps) * g + b


# ----------------------------------------------------------------------------
# ONE kernel: whole TransformerQAgent forward for a single batch element.
# ----------------------------------------------------------------------------
def _forward_kernel(obs_ref, act_ref,
                    w_obs_ref, bpos_obs_ref, w_act_ref, bpos_act_ref,
                    ln1_g_ref, ln1_b_ref, w_qkv_ref, w_out_ref, b_out_ref,
                    ln2_g_ref, ln2_b_ref, w_ff1_ref, b_ff1_ref, w_ff2_ref, b_ff2_ref,
                    w_d1o_ref, w_d1a_ref, b_d1_ref, w_d2_ref, b_d2_ref,
                    out_ref, *, T, E, heads, dim_head, depth, scale):
    bf16, f32 = jnp.bfloat16, jnp.float32
    HD = heads * dim_head

    # ---- token embeddings; Linear bias + positional embedding pre-folded in bpos_* ----
    obs_tok = jnp.dot(obs_ref[0].astype(bf16), w_obs_ref[...],
                      preferred_element_type=f32) + bpos_obs_ref[...]        # (T, E)
    act_tok = jnp.dot(act_ref[0].astype(bf16), w_act_ref[...],
                      preferred_element_type=f32) + bpos_act_ref[...]        # (T, E)
    # Encoder is permutation-equivariant -> [obs tokens, act tokens] blockwise order.
    x = jnp.concatenate([obs_tok, act_tok], axis=0)                          # (N = 2T, E)

    for l in range(depth):  # static unroll; depth is small
        # ---- x = PreNorm(Attention)(x) + x ----
        xn = _layernorm(x, ln1_g_ref[l], ln1_b_ref[l])
        qkv = jnp.dot(xn.astype(bf16), w_qkv_ref[l],
                      preferred_element_type=f32)                            # (N, 3*HD)
        w_out_l = w_out_ref[l]                                               # (HD, E) bf16
        attn = None
        for h in range(heads):
            lo = h * dim_head
            q = (qkv[:, lo:lo + dim_head] * scale).astype(bf16)              # scale into Q
            k = qkv[:, HD + lo:HD + lo + dim_head].astype(bf16)
            v = qkv[:, 2 * HD + lo:2 * HD + lo + dim_head].astype(bf16)
            dots = lax.dot_general(q, k, (((1,), (1,)), ((), ())),           # Q @ K^T
                                   preferred_element_type=f32)               # (N, N)
            m = jnp.max(dots, axis=-1, keepdims=True)
            p = jnp.exp(dots - m)
            p = p * pl.reciprocal(jnp.sum(p, axis=-1, keepdims=True), approx=True)
            o_h = jnp.dot(p.astype(bf16), v, preferred_element_type=f32)     # (N, D)
            # head gather fused into the out-projection: sum_h o_h @ W_out[h*D:(h+1)*D]
            contrib = jnp.dot(o_h.astype(bf16), w_out_l[lo:lo + dim_head, :],
                              preferred_element_type=f32)                    # (N, E)
            attn = contrib if attn is None else attn + contrib
        x = x + attn + b_out_ref[l]                                          # residual

        # ---- x = PreNorm(FeedForward)(x) + x ----
        xn2 = _layernorm(x, ln2_g_ref[l], ln2_b_ref[l])
        h1 = jnp.dot(xn2.astype(bf16), w_ff1_ref[l],
                     preferred_element_type=f32) + b_ff1_ref[l]              # (N, F)
        h1 = jax.nn.gelu(h1, approximate=True)  # TODO(synk): torch nn.GELU is exact erf
        x = x + jnp.dot(h1.astype(bf16), w_ff2_ref[l],
                        preferred_element_type=f32) + b_ff2_ref[l]           # residual

    # ---- batched ensemble decoders: one wide matmul + one block-diagonal matmul ----
    ft_o = x[T - 1:T, :]            # interleaved position -2 == obs_{T-1}
    ft_a = x[2 * T - 1:2 * T, :]    # interleaved position -1 == act_{T-1}
    hid = (jnp.dot(ft_o.astype(bf16), w_d1o_ref[...], preferred_element_type=f32)
           + jnp.dot(ft_a.astype(bf16), w_d1a_ref[...], preferred_element_type=f32)
           + b_d1_ref[...])                                                  # (1, 2*ne*E)
    hid = hid * (1.0 / (1.0 + jnp.exp(-hid)))                                # Swish
    qvals = jnp.dot(hid.astype(bf16), w_d2_ref[...],                         # block-diag
                    preferred_element_type=f32) + b_d2_ref[...]              # (1, 2*ne)
    out_ref[0] = qvals.astype(out_ref.dtype)


# ----------------------------------------------------------------------------
# Module wrapper
# ----------------------------------------------------------------------------
def _init_dense(key, fan_in, fan_out):
    w = jax.random.normal(key, (fan_in, fan_out), jnp.float32) * (fan_in ** -0.5)
    return w.astype(jnp.bfloat16)   # bf16 weights: MXU-native, halves weight DMA


class TransformerQAgentPallas:
    """Forward pass of TransformerQAgent: token embeds + pos, interleaved (obs, act),
    ScaleDot Transformer encoder (PreNorm Attention / FeedForward + residuals),
    last two tokens concat, n_ensemble x 2 LinearDecoder(2E -> E -> 1) heads."""

    def __init__(self, obs_dim, action_dim, context_len, n_embed, n_head,
                 n_layer, n_ensemble, dim_head=64, key=None):
        self.obs_dim = obs_dim
        self.action_dim = action_dim
        self.time_step = context_len
        self.embed_dim = n_embed
        self.heads = n_head
        self.dim_head = dim_head
        self.inner_dim = n_head * dim_head
        self.depth = n_layer
        self.n_ensemble = n_ensemble
        self.mlp_dim = n_embed * 4
        self.scale = dim_head ** -0.5
        self.project_out = not (n_head == 1 and dim_head == n_embed)

        key = key if key is not None else jax.random.PRNGKey(0)
        ks = iter(jax.random.split(key, 8 + 8 * n_layer + 8 * n_ensemble))
        E, HD, F, T = n_embed, self.inner_dim, self.mlp_dim, context_len

        def bias(shape, k, s=0.05):
            return jax.random.normal(k, shape, jnp.float32) * s

        # token embeddings (nn.Linear, bias=True) + positional embeddings
        self.w_obs = _init_dense(next(ks), obs_dim, E)
        self.b_obs = bias((1, E), next(ks))
        self.w_act = _init_dense(next(ks), action_dim, E)
        self.b_act = bias((1, E), next(ks))
        self.obs_pos = jax.random.normal(next(ks), (1, T, E), jnp.float32)
        self.act_pos = jax.random.normal(next(ks), (1, T, E), jnp.float32)
        # Linear bias + positional embedding folded together for the kernel epilogue.
        self.bpos_obs = self.b_obs + self.obs_pos[0]        # (T, E)
        self.bpos_act = self.b_act + self.act_pos[0]        # (T, E)

        # transformer layers, stacked along a leading layer axis (kept VMEM-resident)
        w_qkv, w_out, b_out, w_ff1, b_ff1, w_ff2, b_ff2 = [], [], [], [], [], [], []
        for _ in range(n_layer):
            w_qkv.append(_init_dense(next(ks), E, 3 * HD))                  # bias=False
            if self.project_out:
                w_out.append(_init_dense(next(ks), HD, E))
                b_out.append(bias((1, E), next(ks)))
            else:  # nn.Identity(): implemented as an exact identity projection
                w_out.append(jnp.eye(HD, E, dtype=jnp.float32).astype(jnp.bfloat16))
                b_out.append(jnp.zeros((1, E), jnp.float32))
            w_ff1.append(_init_dense(next(ks), E, F))
            b_ff1.append(bias((1, F), next(ks)))
            w_ff2.append(_init_dense(next(ks), F, E))
            b_ff2.append(bias((1, E), next(ks)))
        self.ln1_g = jnp.ones((n_layer, 1, E), jnp.float32)
        self.ln1_b = jnp.zeros((n_layer, 1, E), jnp.float32)
        self.ln2_g = jnp.ones((n_layer, 1, E), jnp.float32)
        self.ln2_b = jnp.zeros((n_layer, 1, E), jnp.float32)
        self.w_qkv = jnp.stack(w_qkv)
        self.w_out = jnp.stack(w_out)
        self.b_out = jnp.stack(b_out)
        self.w_ff1 = jnp.stack(w_ff1)
        self.b_ff1 = jnp.stack(b_ff1)
        self.w_ff2 = jnp.stack(w_ff2)
        self.b_ff2 = jnp.stack(b_ff2)

        # 2*n_ensemble LinearDecoder(2E -> E -> 1) heads, batched into two matmuls.
        # Order: decoder_list1[0..ne-1] then decoder_list2[0..ne-1].
        self.dec_params = []
        for _ in range(2 * n_ensemble):
            self.dec_params.append((
                _init_dense(next(ks), 2 * E, E), bias((1, E), next(ks)),
                _init_dense(next(ks), E, 1), bias((1, 1), next(ks))))

        ne = n_ensemble
        w1_all = jnp.concatenate([p[0].astype(jnp.float32) for p in self.dec_params],
                                 axis=1)                                    # (2E, 2*ne*E)
        self.w_d1o = w1_all[:E].astype(jnp.bfloat16)                        # (E, 2*ne*E)
        self.w_d1a = w1_all[E:].astype(jnp.bfloat16)                        # (E, 2*ne*E)
        self.b_d1 = jnp.concatenate([p[1] for p in self.dec_params], axis=1)  # (1, 2*ne*E)
        w2_bd = jnp.zeros((2 * ne * E, 2 * ne), jnp.float32)                # block-diagonal
        for i, p in enumerate(self.dec_params):
            w2_bd = w2_bd.at[i * E:(i + 1) * E, i].set(p[2].astype(jnp.float32)[:, 0])
        self.w_d2 = w2_bd.astype(jnp.bfloat16)
        self.b_d2 = jnp.concatenate([p[3] for p in self.dec_params], axis=1)  # (1, 2*ne)

    # ---- Pallas forward: a single fused pallas_call --------------------------------
    def __call__(self, obs, action):
        B, T, _ = obs.shape
        assert T == self.time_step
        ne = self.n_ensemble
        kern = functools.partial(
            _forward_kernel, T=T, E=self.embed_dim, heads=self.heads,
            dim_head=self.dim_head, depth=self.depth, scale=self.scale)

        def resident(a):  # full-array block, constant index map -> fetched once, stays in VMEM
            zeros = (0,) * a.ndim

            def idx(b):
                return zeros

            return pl.BlockSpec(a.shape, idx)

        weights = (self.w_obs, self.bpos_obs, self.w_act, self.bpos_act,
                   self.ln1_g, self.ln1_b, self.w_qkv, self.w_out, self.b_out,
                   self.ln2_g, self.ln2_b, self.w_ff1, self.b_ff1,
                   self.w_ff2, self.b_ff2,
                   self.w_d1o, self.w_d1a, self.b_d1, self.w_d2, self.b_d2)
        in_specs = ([pl.BlockSpec((1, T, self.obs_dim), lambda b: (b, 0, 0)),
                     pl.BlockSpec((1, T, self.action_dim), lambda b: (b, 0, 0))]
                    + [resident(a) for a in weights])

        out = pl.pallas_call(
            kern,
            out_shape=jax.ShapeDtypeStruct((B, 1, 2 * ne), jnp.float32),
            grid=(B,),                        # parallel over batch: feeds both v7x TCs
            in_specs=in_specs,
            out_specs=pl.BlockSpec((1, 1, 2 * ne), lambda b: (b, 0, 0)),
            compiler_params=pltpu.CompilerParams(
                dimension_semantics=("parallel",),
                vmem_limit_bytes=_VMEM_LIMIT),
        )(obs, action, *weights)

        q = out.reshape(B, 2 * ne)            # (B, 2*n_ensemble)
        q1 = [q[:, i:i + 1] for i in range(ne)]
        q2 = [q[:, ne + i:ne + i + 1] for i in range(ne)]
        return q1, q2

    # ---- pure-JAX f32 reference (interleaved token order, per-op) -------------------
    def reference(self, obs, action):
        f = lambda w: w.astype(jnp.float32)

        def ln(x, g, b):
            mu = x.mean(-1, keepdims=True)
            var = ((x - mu) ** 2).mean(-1, keepdims=True)
            return (x - mu) * jax.lax.rsqrt(var + 1e-5) * g + b

        B, T, _ = obs.shape
        E, H, D, HD = self.embed_dim, self.heads, self.dim_head, self.inner_dim
        obs_tok = (obs.reshape(B * T, -1) @ f(self.w_obs) + self.b_obs
                   ).reshape(B, T, E) + self.obs_pos
        act_tok = (action.reshape(B * T, -1) @ f(self.w_act) + self.b_act
                   ).reshape(B, T, E) + self.act_pos
        x = jnp.stack([obs_tok, act_tok], axis=2).reshape(B, 2 * T, E)   # interleaved
        N = 2 * T
        for l in range(self.depth):
            t = ln(x, self.ln1_g[l], self.ln1_b[l])
            qkv = (t.reshape(B * N, E) @ f(self.w_qkv[l])).reshape(B, N, 3, H, D)
            q, k, v = qkv[:, :, 0], qkv[:, :, 1], qkv[:, :, 2]           # (B, N, H, D)
            dots = jnp.einsum("bnhd,bmhd->bhnm", q, k) * self.scale
            a = jax.nn.softmax(dots, axis=-1)
            o = jnp.einsum("bhnm,bmhd->bnhd", a, v).reshape(B * N, HD)
            o = o @ f(self.w_out[l]) + self.b_out[l]
            x = x + o.reshape(B, N, E)
            t2 = ln(x, self.ln2_g[l], self.ln2_b[l]).reshape(B * N, E)
            hmid = jax.nn.gelu(t2 @ f(self.w_ff1[l]) + self.b_ff1[l], approximate=True)
            x = x + (hmid @ f(self.w_ff2[l]) + self.b_ff2[l]).reshape(B, N, E)
        first = jnp.concatenate([x[:, -2], x[:, -1]], axis=1)            # (B, 2E)

        def dec(p):
            w1, b1, w2, b2 = p
            hid = first @ f(w1) + b1
            hid = hid * jax.nn.sigmoid(hid)
            return hid @ f(w2) + b2

        q1 = [dec(self.dec_params[i]) for i in range(self.n_ensemble)]
        q2 = [dec(self.dec_params[self.n_ensemble + i]) for i in range(self.n_ensemble)]
        return q1, q2


if __name__ == "__main__":
    # Small config consistent with the module: batch=2, context_len=8 (-> 16 tokens),
    # obs_dim=11, action_dim=3, n_embed=32, n_head=4, dim_head=16, n_layer=2, n_ensemble=2.
    B, T = 2, 8
    obs_dim, action_dim = 11, 3
    n_embed, n_head, dim_head, n_layer, n_ensemble = 32, 4, 16, 2, 2

    key = jax.random.PRNGKey(0)
    k_param, k_obs, k_act = jax.random.split(key, 3)
    agent = TransformerQAgentPallas(obs_dim, action_dim, T, n_embed, n_head,
                                    n_layer, n_ensemble, dim_head=dim_head, key=k_param)
    obs = jax.random.normal(k_obs, (B, T, obs_dim), jnp.float32)
    action = jax.random.normal(k_act, (B, T, action_dim), jnp.float32)

    q1, q2 = agent(obs, action)
    jax.block_until_ready(q1 + q2)

    # Check against a pure-JAX f32 reference.  The kernel uses bf16 MXU inputs and an
    # approximate softmax reciprocal, so the bound mixes absolute and relative parts.
    r1, r2 = agent.reference(obs, action)
    y = jnp.stack(q1 + q2)
    yr = jnp.stack(r1 + r2)
    assert y.shape == (2 * n_ensemble, B, 1)
    err = float(jnp.max(jnp.abs(y - yr)))
    ref_scale = float(jnp.max(jnp.abs(yr)))
    assert err <= max(0.15, 0.1 * ref_scale), f"max abs err {err} (ref scale {ref_scale})"
    print("KERNEL_OK")
</pallas_src>

<mosaic_0001>
module attributes {stable_mosaic.version = 11 : i64} {
  func.func @_forward_kernel(%arg0: i32, %arg1: memref<1x8x11xf32, #tpu.memory_space<vmem>>, %arg2: memref<1x8x3xf32, #tpu.memory_space<vmem>>, %arg3: memref<11x32xbf16, #tpu.memory_space<vmem>>, %arg4: memref<8x32xf32, #tpu.memory_space<vmem>>, %arg5: memref<3x32xbf16, #tpu.memory_space<vmem>>, %arg6: memref<8x32xf32, #tpu.memory_space<vmem>>, %arg7: memref<2x1x32xf32, #tpu.memory_space<vmem>>, %arg8: memref<2x1x32xf32, #tpu.memory_space<vmem>>, %arg9: memref<2x32x192xbf16, #tpu.memory_space<vmem>>, %arg10: memref<2x64x32xbf16, #tpu.memory_space<vmem>>, %arg11: memref<2x1x32xf32, #tpu.memory_space<vmem>>, %arg12: memref<2x1x32xf32, #tpu.memory_space<vmem>>, %arg13: memref<2x1x32xf32, #tpu.memory_space<vmem>>, %arg14: memref<2x32x128xbf16, #tpu.memory_space<vmem>>, %arg15: memref<2x1x128xf32, #tpu.memory_space<vmem>>, %arg16: memref<2x128x32xbf16, #tpu.memory_space<vmem>>, %arg17: memref<2x1x32xf32, #tpu.memory_space<vmem>>, %arg18: memref<32x128xbf16, #tpu.memory_space<vmem>>, %arg19: memref<32x128xbf16, #tpu.memory_space<vmem>>, %arg20: memref<1x128xf32, #tpu.memory_space<vmem>>, %arg21: memref<128x4xbf16, #tpu.memory_space<vmem>>, %arg22: memref<1x4xf32, #tpu.memory_space<vmem>>, %arg23: memref<1x1x4xf32, #tpu.memory_space<vmem>>) attributes {dimension_semantics = [#tpu.dimension_semantics<parallel>], iteration_bounds = array<i64: 2>, scalar_prefetch = 0 : i64, scratch_operands = 0 : i64, tpu.core_type = #tpu.core_type<tc>, window_params = [{transform_indices = @transform_0, window_bounds = array<i64: 1, 8, 11>}, {transform_indices = @transform_1, window_bounds = array<i64: 1, 8, 3>}, {pipeline_mode = #tpu.pipeline_mode<synchronous>, transform_indices = @transform_2, window_bounds = array<i64: 11, 32>}, {pipeline_mode = #tpu.pipeline_mode<synchronous>, transform_indices = @transform_3, window_bounds = array<i64: 8, 32>}, {pipeline_mode = #tpu.pipeline_mode<synchronous>, transform_indices = @transform_4, window_bounds = array<i64: 3, 32>}, {pipeline_mode = #tpu.pipeline_mode<synchronous>, transform_indices = @transform_5, window_bounds = array<i64: 8, 32>}, {pipeline_mode = #tpu.pipeline_mode<synchronous>, transform_indices = @transform_6, window_bounds = array<i64: 2, 1, 32>}, {pipeline_mode = #tpu.pipeline_mode<synchronous>, transform_indices = @transform_7, window_bounds = array<i64: 2, 1, 32>}, {pipeline_mode = #tpu.pipeline_mode<synchronous>, transform_indices = @transform_8, window_bounds = array<i64: 2, 32, 192>}, {pipeline_mode = #tpu.pipeline_mode<synchronous>, transform_indices = @transform_9, window_bounds = array<i64: 2, 64, 32>}, {pipeline_mode = #tpu.pipeline_mode<synchronous>, transform_indices = @transform_10, window_bounds = array<i64: 2, 1, 32>}, {pipeline_mode = #tpu.pipeline_mode<synchronous>, transform_indices = @transform_11, window_bounds = array<i64: 2, 1, 32>}, {pipeline_mode = #tpu.pipeline_mode<synchronous>, transform_indices = @transform_12, window_bounds = array<i64: 2, 1, 32>}, {pipeline_mode = #tpu.pipeline_mode<synchronous>, transform_indices = @transform_13, window_bounds = array<i64: 2, 32, 128>}, {pipeline_mode = #tpu.pipeline_mode<synchronous>, transform_indices = @transform_14, window_bounds = array<i64: 2, 1, 128>}, {pipeline_mode = #tpu.pipeline_mode<synchronous>, transform_indices = @transform_15, window_bounds = array<i64: 2, 128, 32>}, {pipeline_mode = #tpu.pipeline_mode<synchronous>, transform_indices = @transform_16, window_bounds = array<i64: 2, 1, 32>}, {pipeline_mode = #tpu.pipeline_mode<synchronous>, transform_indices = @transform_17, window_bounds = array<i64: 32, 128>}, {pipeline_mode = #tpu.pipeline_mode<synchronous>, transform_indices = @transform_18, window_bounds = array<i64: 32, 128>}, {pipeline_mode = #tpu.pipeline_mode<synchronous>, transform_indices = @transform_19, window_bounds = array<i64: 1, 128>}, {pipeline_mode = #tpu.pipeline_mode<synchronous>, transform_indices = @transform_20, window_bounds = array<i64: 128, 4>}, {pipeline_mode = #tpu.pipeline_mode<synchronous>, transform_indices = @transform_21, window_bounds = array<i64: 1, 4>}, {transform_indices = @transform_22, window_bounds = array<i64: 1, 1, 4>}]} {
    %c0 = arith.constant 0 : index
    %c0_0 = arith.constant 0 : index
    %c0_1 = arith.constant 0 : index
    %0 = vector.load %arg1[%c0, %c0_0, %c0_1] : memref<1x8x11xf32, #tpu.memory_space<vmem>>, vector<1x8x11xf32>
    %1 = vector.shape_cast %0 : vector<1x8x11xf32> to vector<8x11xf32>
    %2 = arith.truncf %1 : vector<8x11xf32> to vector<8x11xbf16>
    %c0_2 = arith.constant 0 : index
    %c0_3 = arith.constant 0 : index
    %3 = vector.load %arg3[%c0_2, %c0_3] : memref<11x32xbf16, #tpu.memory_space<vmem>>, vector<11x32xbf16>
    %cst = arith.constant dense<0.000000e+00> : vector<8x32xf32>
    %4 = tpu.matmul %2, %3, %cst {dimension_numbers = #tpu.dot_dimension_numbers<[1], [0], [0], [1], [0, 0, 1, 1], [], []>} : vector<8x11xbf16>, vector<11x32xbf16>, vector<8x32xf32> -> vector<8x32xf32>
    %c0_4 = arith.constant 0 : index
    %c0_5 = arith.constant 0 : index
    %5 = vector.load %arg4[%c0_4, %c0_5] : memref<8x32xf32, #tpu.memory_space<vmem>>, vector<8x32xf32>
    %6 = arith.addf %4, %5 : vector<8x32xf32>
    %c0_6 = arith.constant 0 : index
    %c0_7 = arith.constant 0 : index
    %c0_8 = arith.constant 0 : index
    %7 = vector.load %arg2[%c0_6, %c0_7, %c0_8] : memref<1x8x3xf32, #tpu.memory_space<vmem>>, vector<1x8x3xf32>
    %8 = vector.shape_cast %7 : vector<1x8x3xf32> to vector<8x3xf32>
    %9 = arith.truncf %8 : vector<8x3xf32> to vector<8x3xbf16>
    %c0_9 = arith.constant 0 : index
    %c0_10 = arith.constant 0 : index
    %10 = vector.load %arg5[%c0_9, %c0_10] : memref<3x32xbf16, #tpu.memory_space<vmem>>, vector<3x32xbf16>
    %cst_11 = arith.constant dense<0.000000e+00> : vector<8x32xf32>
    %11 = tpu.matmul %9, %10, %cst_11 {dimension_numbers = #tpu.dot_dimension_numbers<[1], [0], [0], [1], [0, 0, 1, 1], [], []>} : vector<8x3xbf16>, vector<3x32xbf16>, vector<8x32xf32> -> vector<8x32xf32>
    %c0_12 = arith.constant 0 : index
    %c0_13 = arith.constant 0 : index
    %12 = vector.load %arg6[%c0_12, %c0_13] : memref<8x32xf32, #tpu.memory_space<vmem>>, vector<8x32xf32>
    %13 = arith.addf %11, %12 : vector<8x32xf32>
    %14 = tpu.concatenate %6, %13 in 0 : vector<8x32xf32>, vector<8x32xf32> -> vector<16x32xf32>
    %c0_14 = arith.constant 0 : index
    %c0_15 = arith.constant 0 : index
    %c0_16 = arith.constant 0 : index
    %15 = vector.load %arg7[%c0_14, %c0_15, %c0_16] : memref<2x1x32xf32, #tpu.memory_space<vmem>>, vector<1x1x32xf32>
    %16 = vector.shape_cast %15 : vector<1x1x32xf32> to vector<1x32xf32>
    %c0_17 = arith.constant 0 : index
    %c0_18 = arith.constant 0 : index
    %c0_19 = arith.constant 0 : index
    %17 = vector.load %arg8[%c0_17, %c0_18, %c0_19] : memref<2x1x32xf32, #tpu.memory_space<vmem>>, vector<1x1x32xf32>
    %18 = vector.shape_cast %17 : vector<1x1x32xf32> to vector<1x32xf32>
    %cst_20 = arith.constant dense<0.000000e+00> : vector<16xf32>
    %19 = vector.multi_reduction <add>, %14, %cst_20 [1] : vector<16x32xf32> to vector<16xf32>
    %20 = vector.shape_cast %19 : vector<16xf32> to vector<16x1xf32>
    %cst_21 = arith.constant 3.200000e+01 : f32
    %21 = vector.broadcast %cst_21 : f32 to vector<16x1xf32>
    %22 = arith.divf %20, %21 : vector<16x1xf32>
    %23 = vector.broadcast %22 : vector<16x1xf32> to vector<16x32xf32>
    %24 = arith.subf %14, %23 : vector<16x32xf32>
    %25 = arith.mulf %24, %24 : vector<16x32xf32>
    %cst_22 = arith.constant dense<0.000000e+00> : vector<16xf32>
    %26 = vector.multi_reduction <add>, %25, %cst_22 [1] : vector<16x32xf32> to vector<16xf32>
    %27 = vector.shape_cast %26 : vector<16xf32> to vector<16x1xf32>
    %cst_23 = arith.constant 3.200000e+01 : f32
    %28 = vector.broadcast %cst_23 : f32 to vector<16x1xf32>
    %29 = arith.divf %27, %28 : vector<16x1xf32>
    %30 = vector.broadcast %22 : vector<16x1xf32> to vector<16x32xf32>
    %31 = arith.subf %14, %30 : vector<16x32xf32>
    %cst_24 = arith.constant 9.99999974E-6 : f32
    %32 = vector.broadcast %cst_24 : f32 to vector<16x1xf32>
    %33 = arith.addf %29, %32 : vector<16x1xf32>
    %34 = math.rsqrt %33 : vector<16x1xf32>
    %35 = vector.broadcast %34 : vector<16x1xf32> to vector<16x32xf32>
    %36 = arith.mulf %31, %35 : vector<16x32xf32>
    %37 = vector.broadcast %16 : vector<1x32xf32> to vector<16x32xf32>
    %38 = arith.mulf %36, %37 : vector<16x32xf32>
    %39 = vector.broadcast %18 : vector<1x32xf32> to vector<16x32xf32>
    %40 = arith.addf %38, %39 : vector<16x32xf32>
    %41 = arith.truncf %40 : vector<16x32xf32> to vector<16x32xbf16>
    %c0_25 = arith.constant 0 : index
    %c0_26 = arith.constant 0 : index
    %c0_27 = arith.constant 0 : index
    %42 = vector.load %arg9[%c0_25, %c0_26, %c0_27] : memref<2x32x192xbf16, #tpu.memory_space<vmem>>, vector<1x32x192xbf16>
    %43 = vector.shape_cast %42 : vector<1x32x192xbf16> to vector<32x192xbf16>
    %cst_28 = arith.constant dense<0.000000e+00> : vector<16x192xf32>
    %44 = tpu.matmul %41, %43, %cst_28 {dimension_numbers = #tpu.dot_dimension_numbers<[1], [0], [0], [1], [0, 0, 1, 1], [], []>} : vector<16x32xbf16>, vector<32x192xbf16>, vector<16x192xf32> -> vector<16x192xf32>
    %c0_29 = arith.constant 0 : index
    %c0_30 = arith.constant 0 : index
    %c0_31 = arith.constant 0 : index
    %45 = vector.load %arg10[%c0_29, %c0_30, %c0_31] : memref<2x64x32xbf16, #tpu.memory_space<vmem>>, vector<1x64x32xbf16>
    %46 = vector.shape_cast %45 : vector<1x64x32xbf16> to vector<64x32xbf16>
    %47 = vector.extract_strided_slice %44 {offsets = [0, 0], sizes = [16, 16], strides = [1, 1]} : vector<16x192xf32> to vector<16x16xf32>
    %cst_32 = arith.constant 2.500000e-01 : f32
    %48 = vector.broadcast %cst_32 : f32 to vector<16x16xf32>
    %49 = arith.mulf %47, %48 : vector<16x16xf32>
    %50 = arith.truncf %49 : vector<16x16xf32> to vector<16x16xbf16>
    %51 = vector.extract_strided_slice %44 {offsets = [0, 64], sizes = [16, 16], strides = [1, 1]} : vector<16x192xf32> to vector<16x16xf32>
    %52 = arith.truncf %51 : vector<16x16xf32> to vector<16x16xbf16>
    %53 = vector.extract_strided_slice %44 {offsets = [0, 128], sizes = [16, 16], strides = [1, 1]} : vector<16x192xf32> to vector<16x16xf32>
    %54 = arith.truncf %53 : vector<16x16xf32> to vector<16x16xbf16>
    %cst_33 = arith.constant dense<0.000000e+00> : vector<16x16xf32>
    %55 = tpu.matmul %50, %52, %cst_33 {dimension_numbers = #tpu.dot_dimension_numbers<[1], [1], [0], [0], [0, 0, 1, 0], [], []>} : vector<16x16xbf16>, vector<16x16xbf16>, vector<16x16xf32> -> vector<16x16xf32>
    %cst_34 = arith.constant dense<0xFF800000> : vector<16xf32>
    %56 = vector.multi_reduction <maximumf>, %55, %cst_34 [1] : vector<16x16xf32> to vector<16xf32>
    %57 = vector.shape_cast %56 : vector<16xf32> to vector<16x1xf32>
    %58 = vector.broadcast %57 : vector<16x1xf32> to vector<16x16xf32>
    %59 = arith.subf %55, %58 : vector<16x16xf32>
    %60 = math.exp %59 : vector<16x16xf32>
    %cst_35 = arith.constant dense<0.000000e+00> : vector<16xf32>
    %61 = vector.multi_reduction <add>, %60, %cst_35 [1] : vector<16x16xf32> to vector<16xf32>
    %62 = vector.shape_cast %61 : vector<16xf32> to vector<16x1xf32>
    %63 = tpu.reciprocal %62 {approx = true} : vector<16x1xf32> -> vector<16x1xf32>
    %64 = vector.broadcast %63 : vector<16x1xf32> to vector<16x16xf32>
    %65 = arith.mulf %60, %64 : vector<16x16xf32>
    %66 = arith.truncf %65 : vector<16x16xf32> to vector<16x16xbf16>
    %cst_36 = arith.constant dense<0.000000e+00> : vector<16x16xf32>
    %67 = tpu.matmul %66, %54, %cst_36 {dimension_numbers = #tpu.dot_dimension_numbers<[1], [0], [0], [1], [0, 0, 1, 1], [], []>} : vector<16x16xbf16>, vector<16x16xbf16>, vector<16x16xf32> -> vector<16x16xf32>
    %68 = arith.truncf %67 : vector<16x16xf32> to vector<16x16xbf16>
    %69 = vector.extract_strided_slice %46 {offsets = [0, 0], sizes = [16, 32], strides = [1, 1]} : vector<64x32xbf16> to vector<16x32xbf16>
    %cst_37 = arith.constant dense<0.000000e+00> : vector<16x32xf32>
    %70 = tpu.matmul %68, %69, %cst_37 {dimension_numbers = #tpu.dot_dimension_numbers<[1], [0], [0], [1], [0, 0, 1, 1], [], []>} : vector<16x16xbf16>, vector<16x32xbf16>, vector<16x32xf32> -> vector<16x32xf32>
    %71 = vector.extract_strided_slice %44 {offsets = [0, 16], sizes = [16, 16], strides = [1, 1]} : vector<16x192xf32> to vector<16x16xf32>
    %cst_38 = arith.constant 2.500000e-01 : f32
    %72 = vector.broadcast %cst_38 : f32 to vector<16x16xf32>
    %73 = arith.mulf %71, %72 : vector<16x16xf32>
    %74 = arith.truncf %73 : vector<16x16xf32> to vector<16x16xbf16>
    %75 = vector.extract_strided_slice %44 {offsets = [0, 80], sizes = [16, 16], strides = [1, 1]} : vector<16x192xf32> to vector<16x16xf32>
    %76 = arith.truncf %75 : vector<16x16xf32> to vector<16x16xbf16>
    %77 = vector.extract_strided_slice %44 {offsets = [0, 144], sizes = [16, 16], strides = [1, 1]} : vector<16x192xf32> to vector<16x16xf32>
    %78 = arith.truncf %77 : vector<16x16xf32> to vector<16x16xbf16>
    %cst_39 = arith.constant dense<0.000000e+00> : vector<16x16xf32>
    %79 = tpu.matmul %74, %76, %cst_39 {dimension_numbers = #tpu.dot_dimension_numbers<[1], [1], [0], [0], [0, 0, 1, 0], [], []>} : vector<16x16xbf16>, vector<16x16xbf16>, vector<16x16xf32> -> vector<16x16xf32>
    %cst_40 = arith.constant dense<0xFF800000> : vector<16xf32>
    %80 = vector.multi_reduction <maximumf>, %79, %cst_40 [1] : vector<16x16xf32> to vector<16xf32>
    %81 = vector.shape_cast %80 : vector<16xf32> to vector<16x1xf32>
    %82 = vector.broadcast %81 : vector<16x1xf32> to vector<16x16xf32>
    %83 = arith.subf %79, %82 : vector<16x16xf32>
    %84 = math.exp %83 : vector<16x16xf32>
    %cst_41 = arith.constant dense<0.000000e+00> : vector<16xf32>
    %85 = vector.multi_reduction <add>, %84, %cst_41 [1] : vector<16x16xf32> to vector<16xf32>
    %86 = vector.shape_cast %85 : vector<16xf32> to vector<16x1xf32>
    %87 = tpu.reciprocal %86 {approx = true} : vector<16x1xf32> -> vector<16x1xf32>
    %88 = vector.broadcast %87 : vector<16x1xf32> to vector<16x16xf32>
    %89 = arith.mulf %84, %88 : vector<16x16xf32>
    %90 = arith.truncf %89 : vector<16x16xf32> to vector<16x16xbf16>
    %cst_42 = arith.constant dense<0.000000e+00> : vector<16x16xf32>
    %91 = tpu.matmul %90, %78, %cst_42 {dimension_numbers = #tpu.dot_dimension_numbers<[1], [0], [0], [1], [0, 0, 1, 1], [], []>} : vector<16x16xbf16>, vector<16x16xbf16>, vector<16x16xf32> -> vector<16x16xf32>
    %92 = arith.truncf %91 : vector<16x16xf32> to vector<16x16xbf16>
    %93 = vector.extract_strided_slice %46 {offsets = [16, 0], sizes = [16, 32], strides = [1, 1]} : vector<64x32xbf16> to vector<16x32xbf16>
    %cst_43 = arith.constant dense<0.000000e+00> : vector<16x32xf32>
    %94 = tpu.matmul %92, %93, %cst_43 {dimension_numbers = #tpu.dot_dimension_numbers<[1], [0], [0], [1], [0, 0, 1, 1], [], []>} : vector<16x16xbf16>, vector<16x32xbf16>, vector<16x32xf32> -> vector<16x32xf32>
    %95 = arith.addf %70, %94 : vector<16x32xf32>
    %96 = vector.extract_strided_slice %44 {offsets = [0, 32], sizes = [16, 16], strides = [1, 1]} : vector<16x192xf32> to vector<16x16xf32>
    %cst_44 = arith.constant 2.500000e-01 : f32
    %97 = vector.broadcast %cst_44 : f32 to vector<16x16xf32>
    %98 = arith.mulf %96, %97 : vector<16x16xf32>
    %99 = arith.truncf %98 : vector<16x16xf32> to vector<16x16xbf16>
    %100 = vector.extract_strided_slice %44 {offsets = [0, 96], sizes = [16, 16], strides = [1, 1]} : vector<16x192xf32> to vector<16x16xf32>
    %101 = arith.truncf %100 : vector<16x16xf32> to vector<16x16xbf16>
    %102 = vector.extract_strided_slice %44 {offsets = [0, 160], sizes = [16, 16], strides = [1, 1]} : vector<16x192xf32> to vector<16x16xf32>
    %103 = arith.truncf %102 : vector<16x16xf32> to vector<16x16xbf16>
    %cst_45 = arith.constant dense<0.000000e+00> : vector<16x16xf32>
    %104 = tpu.matmul %99, %101, %cst_45 {dimension_numbers = #tpu.dot_dimension_numbers<[1], [1], [0], [0], [0, 0, 1, 0], [], []>} : vector<16x16xbf16>, vector<16x16xbf16>, vector<16x16xf32> -> vector<16x16xf32>
    %cst_46 = arith.constant dense<0xFF800000> : vector<16xf32>
    %105 = vector.multi_reduction <maximumf>, %104, %cst_46 [1] : vector<16x16xf32> to vector<16xf32>
    %106 = vector.shape_cast %105 : vector<16xf32> to vector<16x1xf32>
    %107 = vector.broadcast %106 : vector<16x1xf32> to vector<16x16xf32>
    %108 = arith.subf %104, %107 : vector<16x16xf32>
    %109 = math.exp %108 : vector<16x16xf32>
    %cst_47 = arith.constant dense<0.000000e+00> : vector<16xf32>
    %110 = vector.multi_reduction <add>, %109, %cst_47 [1] : vector<16x16xf32> to vector<16xf32>
    %111 = vector.shape_cast %110 : vector<16xf32> to vector<16x1xf32>
    %112 = tpu.reciprocal %111 {approx = true} : vector<16x1xf32> -> vector<16x1xf32>
    %113 = vector.broadcast %112 : vector<16x1xf32> to vector<16x16xf32>
    %114 = arith.mulf %109, %113 : vector<16x16xf32>
    %115 = arith.truncf %114 : vector<16x16xf32> to vector<16x16xbf16>
    %cst_48 = arith.constant dense<0.000000e+00> : vector<16x16xf32>
    %116 = tpu.matmul %115, %103, %cst_48 {dimension_numbers = #tpu.dot_dimension_numbers<[1], [0], [0], [1], [0, 0, 1, 1], [], []>} : vector<16x16xbf16>, vector<16x16xbf16>, vector<16x16xf32> -> vector<16x16xf32>
    %117 = arith.truncf %116 : vector<16x16xf32> to vector<16x16xbf16>
    %118 = vector.extract_strided_slice %46 {offsets = [32, 0], sizes = [16, 32], strides = [1, 1]} : vector<64x32xbf16> to vector<16x32xbf16>
    %cst_49 = arith.constant dense<0.000000e+00> : vector<16x32xf32>
    %119 = tpu.matmul %117, %118, %cst_49 {dimension_numbers = #tpu.dot_dimension_numbers<[1], [0], [0], [1], [0, 0, 1, 1], [], []>} : vector<16x16xbf16>, vector<16x32xbf16>, vector<16x32xf32> -> vector<16x32xf32>
    %120 = arith.addf %95, %119 : vector<16x32xf32>
    %121 = vector.extract_strided_slice %44 {offsets = [0, 48], sizes = [16, 16], strides = [1, 1]} : vector<16x192xf32> to vector<16x16xf32>
    %cst_50 = arith.constant 2.500000e-01 : f32
    %122 = vector.broadcast %cst_50 : f32 to vector<16x16xf32>
    %123 = arith.mulf %121, %122 : vector<16x16xf32>
    %124 = arith.truncf %123 : vector<16x16xf32> to vector<16x16xbf16>
    %125 = vector.extract_strided_slice %44 {offsets = [0, 112], sizes = [16, 16], strides = [1, 1]} : vector<16x192xf32> to vector<16x16xf32>
    %126 = arith.truncf %125 : vector<16x16xf32> to vector<16x16xbf16>
    %127 = vector.extract_strided_slice %44 {offsets = [0, 176], sizes = [16, 16], strides = [1, 1]} : vector<16x192xf32> to vector<16x16xf32>
    %128 = arith.truncf %127 : vector<16x16xf32> to vector<16x16xbf16>
    %cst_51 = arith.constant dense<0.000000e+00> : vector<16x16xf32>
    %129 = tpu.matmul %124, %126, %cst_51 {dimension_numbers = #tpu.dot_dimension_numbers<[1], [1], [0], [0], [0, 0, 1, 0], [], []>} : vector<16x16xbf16>, vector<16x16xbf16>, vector<16x16xf32> -> vector<16x16xf32>
    %cst_52 = arith.constant dense<0xFF800000> : vector<16xf32>
    %130 = vector.multi_reduction <maximumf>, %129, %cst_52 [1] : vector<16x16xf32> to vector<16xf32>
    %131 = vector.shape_cast %130 : vector<16xf32> to vector<16x1xf32>
    %132 = vector.broadcast %131 : vector<16x1xf32> to vector<16x16xf32>
    %133 = arith.subf %129, %132 : vector<16x16xf32>
    %134 = math.exp %133 : vector<16x16xf32>
    %cst_53 = arith.constant dense<0.000000e+00> : vector<16xf32>
    %135 = vector.multi_reduction <add>, %134, %cst_53 [1] : vector<16x16xf32> to vector<16xf32>
    %136 = vector.shape_cast %135 : vector<16xf32> to vector<16x1xf32>
    %137 = tpu.reciprocal %136 {approx = true} : vector<16x1xf32> -> vector<16x1xf32>
    %138 = vector.broadcast %137 : vector<16x1xf32> to vector<16x16xf32>
    %139 = arith.mulf %134, %138 : vector<16x16xf32>
    %140 = arith.truncf %139 : vector<16x16xf32> to vector<16x16xbf16>
    %cst_54 = arith.constant dense<0.000000e+00> : vector<16x16xf32>
    %141 = tpu.matmul %140, %128, %cst_54 {dimension_numbers = #tpu.dot_dimension_numbers<[1], [0], [0], [1], [0, 0, 1, 1], [], []>} : vector<16x16xbf16>, vector<16x16xbf16>, vector<16x16xf32> -> vector<16x16xf32>
    %142 = arith.truncf %141 : vector<16x16xf32> to vector<16x16xbf16>
    %143 = vector.extract_strided_slice %46 {offsets = [48, 0], sizes = [16, 32], strides = [1, 1]} : vector<64x32xbf16> to vector<16x32xbf16>
    %cst_55 = arith.constant dense<0.000000e+00> : vector<16x32xf32>
    %144 = tpu.matmul %142, %143, %cst_55 {dimension_numbers = #tpu.dot_dimension_numbers<[1], [0], [0], [1], [0, 0, 1, 1], [], []>} : vector<16x16xbf16>, vector<16x32xbf16>, vector<16x32xf32> -> vector<16x32xf32>
    %145 = arith.addf %120, %144 : vector<16x32xf32>
    %146 = arith.addf %14, %145 : vector<16x32xf32>
    %c0_56 = arith.constant 0 : index
    %c0_57 = arith.constant 0 : index
    %c0_58 = arith.constant 0 : index
    %147 = vector.load %arg11[%c0_56, %c0_57, %c0_58] : memref<2x1x32xf32, #tpu.memory_space<vmem>>, vector<1x1x32xf32>
    %148 = vector.shape_cast %147 : vector<1x1x32xf32> to vector<1x32xf32>
    %149 = vector.broadcast %148 : vector<1x32xf32> to vector<16x32xf32>
    %150 = arith.addf %146, %149 : vector<16x32xf32>
    %c0_59 = arith.constant 0 : index
    %c0_60 = arith.constant 0 : index
    %c0_61 = arith.constant 0 : index
    %151 = vector.load %arg12[%c0_59, %c0_60, %c0_61] : memref<2x1x32xf32, #tpu.memory_space<vmem>>, vector<1x1x32xf32>
    %152 = vector.shape_cast %151 : vector<1x1x32xf32> to vector<1x32xf32>
    %c0_62 = arith.constant 0 : index
    %c0_63 = arith.constant 0 : index
    %c0_64 = arith.constant 0 : index
    %153 = vector.load %arg13[%c0_62, %c0_63, %c0_64] : memref<2x1x32xf32, #tpu.memory_space<vmem>>, vector<1x1x32xf32>
    %154 = vector.shape_cast %153 : vector<1x1x32xf32> to vector<1x32xf32>
    %cst_65 = arith.constant dense<0.000000e+00> : vector<16xf32>
    %155 = vector.multi_reduction <add>, %150, %cst_65 [1] : vector<16x32xf32> to vector<16xf32>
    %156 = vector.shape_cast %155 : vector<16xf32> to vector<16x1xf32>
    %cst_66 = arith.constant 3.200000e+01 : f32
    %157 = vector.broadcast %cst_66 : f32 to vector<16x1xf32>
    %158 = arith.divf %156, %157 : vector<16x1xf32>
    %159 = vector.broadcast %158 : vector<16x1xf32> to vector<16x32xf32>
    %160 = arith.subf %150, %159 : vector<16x32xf32>
    %161 = arith.mulf %160, %160 : vector<16x32xf32>
    %cst_67 = arith.constant dense<0.000000e+00> : vector<16xf32>
    %162 = vector.multi_reduction <add>, %161, %cst_67 [1] : vector<16x32xf32> to vector<16xf32>
    %163 = vector.shape_cast %162 : vector<16xf32> to vector<16x1xf32>
    %cst_68 = arith.constant 3.200000e+01 : f32
    %164 = vector.broadcast %cst_68 : f32 to vector<16x1xf32>
    %165 = arith.divf %163, %164 : vector<16x1xf32>
    %166 = vector.broadcast %158 : vector<16x1xf32> to vector<16x32xf32>
    %167 = arith.subf %150, %166 : vector<16x32xf32>
    %cst_69 = arith.constant 9.99999974E-6 : f32
    %168 = vector.broadcast %cst_69 : f32 to vector<16x1xf32>
    %169 = arith.addf %165, %168 : vector<16x1xf32>
    %170 = math.rsqrt %169 : vector<16x1xf32>
    %171 = vector.broadcast %170 : vector<16x1xf32> to vector<16x32xf32>
    %172 = arith.mulf %167, %171 : vector<16x32xf32>
    %173 = vector.broadcast %152 : vector<1x32xf32> to vector<16x32xf32>
    %174 = arith.mulf %172, %173 : vector<16x32xf32>
    %175 = vector.broadcast %154 : vector<1x32xf32> to vector<16x32xf32>
    %176 = arith.addf %174, %175 : vector<16x32xf32>
    %177 = arith.truncf %176 : vector<16x32xf32> to vector<16x32xbf16>
    %c0_70 = arith.constant 0 : index
    %c0_71 = arith.constant 0 : index
    %c0_72 = arith.constant 0 : index
    %178 = vector.load %arg14[%c0_70, %c0_71, %c0_72] : memref<2x32x128xbf16, #tpu.memory_space<vmem>>, vector<1x32x128xbf16>
    %179 = vector.shape_cast %178 : vector<1x32x128xbf16> to vector<32x128xbf16>
    %cst_73 = arith.constant dense<0.000000e+00> : vector<16x128xf32>
    %180 = tpu.matmul %177, %179, %cst_73 {dimension_numbers = #tpu.dot_dimension_numbers<[1], [0], [0], [1], [0, 0, 1, 1], [], []>} : vector<16x32xbf16>, vector<32x128xbf16>, vector<16x128xf32> -> vector<16x128xf32>
    %c0_74 = arith.constant 0 : index
    %c0_75 = arith.constant 0 : index
    %c0_76 = arith.constant 0 : index
    %181 = vector.load %arg15[%c0_74, %c0_75, %c0_76] : memref<2x1x128xf32, #tpu.memory_space<vmem>>, vector<1x1x128xf32>
    %182 = vector.shape_cast %181 : vector<1x1x128xf32> to vector<1x128xf32>
    %183 = vector.broadcast %182 : vector<1x128xf32> to vector<16x128xf32>
    %184 = arith.addf %180, %183 : vector<16x128xf32>
    %185 = arith.mulf %184, %184 : vector<16x128xf32>
    %186 = arith.mulf %184, %185 : vector<16x128xf32>
    %cst_77 = arith.constant 4.471500e-02 : f32
    %187 = vector.broadcast %cst_77 : f32 to vector<16x128xf32>
    %188 = arith.mulf %187, %186 : vector<16x128xf32>
    %189 = arith.addf %184, %188 : vector<16x128xf32>
    %cst_78 = arith.constant 0.797884583 : f32
    %190 = vector.broadcast %cst_78 : f32 to vector<16x128xf32>
    %191 = arith.mulf %190, %189 : vector<16x128xf32>
    %192 = math.tanh %191 : vector<16x128xf32>
    %cst_79 = arith.constant 1.000000e+00 : f32
    %193 = vector.broadcast %cst_79 : f32 to vector<16x128xf32>
    %194 = arith.addf %193, %192 : vector<16x128xf32>
    %cst_80 = arith.constant 5.000000e-01 : f32
    %195 = vector.broadcast %cst_80 : f32 to vector<16x128xf32>
    %196 = arith.mulf %195, %194 : vector<16x128xf32>
    %197 = arith.mulf %184, %196 : vector<16x128xf32>
    %198 = arith.truncf %197 : vector<16x128xf32> to vector<16x128xbf16>
    %c0_81 = arith.constant 0 : index
    %c0_82 = arith.constant 0 : index
    %c0_83 = arith.constant 0 : index
    %199 = vector.load %arg16[%c0_81, %c0_82, %c0_83] : memref<2x128x32xbf16, #tpu.memory_space<vmem>>, vector<1x128x32xbf16>
    %200 = vector.shape_cast %199 : vector<1x128x32xbf16> to vector<128x32xbf16>
    %cst_84 = arith.constant dense<0.000000e+00> : vector<16x32xf32>
    %201 = tpu.matmul %198, %200, %cst_84 {dimension_numbers = #tpu.dot_dimension_numbers<[1], [0], [0], [1], [0, 0, 1, 1], [], []>} : vector<16x128xbf16>, vector<128x32xbf16>, vector<16x32xf32> -> vector<16x32xf32>
    %202 = arith.addf %150, %201 : vector<16x32xf32>
    %c0_85 = arith.constant 0 : index
    %c0_86 = arith.constant 0 : index
    %c0_87 = arith.constant 0 : index
    %203 = vector.load %arg17[%c0_85, %c0_86, %c0_87] : memref<2x1x32xf32, #tpu.memory_space<vmem>>, vector<1x1x32xf32>
    %204 = vector.shape_cast %203 : vector<1x1x32xf32> to vector<1x32xf32>
    %205 = vector.broadcast %204 : vector<1x32xf32> to vector<16x32xf32>
    %206 = arith.addf %202, %205 : vector<16x32xf32>
    %c1 = arith.constant 1 : index
    %c0_88 = arith.constant 0 : index
    %c0_89 = arith.constant 0 : index
    %207 = vector.load %arg7[%c1, %c0_88, %c0_89] : memref<2x1x32xf32, #tpu.memory_space<vmem>>, vector<1x1x32xf32>
    %208 = vector.shape_cast %207 : vector<1x1x32xf32> to vector<1x32xf32>
    %c1_90 = arith.constant 1 : index
    %c0_91 = arith.constant 0 : index
    %c0_92 = arith.constant 0 : index
    %209 = vector.load %arg8[%c1_90, %c0_91, %c0_92] : memref<2x1x32xf32, #tpu.memory_space<vmem>>, vector<1x1x32xf32>
    %210 = vector.shape_cast %209 : vector<1x1x32xf32> to vector<1x32xf32>
    %cst_93 = arith.constant dense<0.000000e+00> : vector<16xf32>
    %211 = vector.multi_reduction <add>, %206, %cst_93 [1] : vector<16x32xf32> to vector<16xf32>
    %212 = vector.shape_cast %211 : vector<16xf32> to vector<16x1xf32>
    %cst_94 = arith.constant 3.200000e+01 : f32
    %213 = vector.broadcast %cst_94 : f32 to vector<16x1xf32>
    %214 = arith.divf %212, %213 : vector<16x1xf32>
    %215 = vector.broadcast %214 : vector<16x1xf32> to vector<16x32xf32>
    %216 = arith.subf %206, %215 : vector<16x32xf32>
    %217 = arith.mulf %216, %216 : vector<16x32xf32>
    %cst_95 = arith.constant dense<0.000000e+00> : vector<16xf32>
    %218 = vector.multi_reduction <add>, %217, %cst_95 [1] : vector<16x32xf32> to vector<16xf32>
    %219 = vector.shape_cast %218 : vector<16xf32> to vector<16x1xf32>
    %cst_96 = arith.constant 3.200000e+01 : f32
    %220 = vector.broadcast %cst_96 : f32 to vector<16x1xf32>
    %221 = arith.divf %219, %220 : vector<16x1xf32>
    %222 = vector.broadcast %214 : vector<16x1xf32> to vector<16x32xf32>
    %223 = arith.subf %206, %222 : vector<16x32xf32>
    %cst_97 = arith.constant 9.99999974E-6 : f32
    %224 = vector.broadcast %cst_97 : f32 to vector<16x1xf32>
    %225 = arith.addf %221, %224 : vector<16x1xf32>
    %226 = math.rsqrt %225 : vector<16x1xf32>
    %227 = vector.broadcast %226 : vector<16x1xf32> to vector<16x32xf32>
    %228 = arith.mulf %223, %227 : vector<16x32xf32>
    %229 = vector.broadcast %208 : vector<1x32xf32> to vector<16x32xf32>
    %230 = arith.mulf %228, %229 : vector<16x32xf32>
    %231 = vector.broadcast %210 : vector<1x32xf32> to vector<16x32xf32>
    %232 = arith.addf %230, %231 : vector<16x32xf32>
    %233 = arith.truncf %232 : vector<16x32xf32> to vector<16x32xbf16>
    %c1_98 = arith.constant 1 : index
    %c0_99 = arith.constant 0 : index
    %c0_100 = arith.constant 0 : index
    %234 = vector.load %arg9[%c1_98, %c0_99, %c0_100] : memref<2x32x192xbf16, #tpu.memory_space<vmem>>, vector<1x32x192xbf16>
    %235 = vector.shape_cast %234 : vector<1x32x192xbf16> to vector<32x192xbf16>
    %cst_101 = arith.constant dense<0.000000e+00> : vector<16x192xf32>
    %236 = tpu.matmul %233, %235, %cst_101 {dimension_numbers = #tpu.dot_dimension_numbers<[1], [0], [0], [1], [0, 0, 1, 1], [], []>} : vector<16x32xbf16>, vector<32x192xbf16>, vector<16x192xf32> -> vector<16x192xf32>
    %c1_102 = arith.constant 1 : index
    %c0_103 = arith.constant 0 : index
    %c0_104 = arith.constant 0 : index
    %237 = vector.load %arg10[%c1_102, %c0_103, %c0_104] : memref<2x64x32xbf16, #tpu.memory_space<vmem>>, vector<1x64x32xbf16>
    %238 = vector.shape_cast %237 : vector<1x64x32xbf16> to vector<64x32xbf16>
    %239 = vector.extract_strided_slice %236 {offsets = [0, 0], sizes = [16, 16], strides = [1, 1]} : vector<16x192xf32> to vector<16x16xf32>
    %cst_105 = arith.constant 2.500000e-01 : f32
    %240 = vector.broadcast %cst_105 : f32 to vector<16x16xf32>
    %241 = arith.mulf %239, %240 : vector<16x16xf32>
    %242 = arith.truncf %241 : vector<16x16xf32> to vector<16x16xbf16>
    %243 = vector.extract_strided_slice %236 {offsets = [0, 64], sizes = [16, 16], strides = [1, 1]} : vector<16x192xf32> to vector<16x16xf32>
    %244 = arith.truncf %243 : vector<16x16xf32> to vector<16x16xbf16>
    %245 = vector.extract_strided_slice %236 {offsets = [0, 128], sizes = [16, 16], strides = [1, 1]} : vector<16x192xf32> to vector<16x16xf32>
    %246 = arith.truncf %245 : vector<16x16xf32> to vector<16x16xbf16>
    %cst_106 = arith.constant dense<0.000000e+00> : vector<16x16xf32>
    %247 = tpu.matmul %242, %244, %cst_106 {dimension_numbers = #tpu.dot_dimension_numbers<[1], [1], [0], [0], [0, 0, 1, 0], [], []>} : vector<16x16xbf16>, vector<16x16xbf16>, vector<16x16xf32> -> vector<16x16xf32>
    %cst_107 = arith.constant dense<0xFF800000> : vector<16xf32>
    %248 = vector.multi_reduction <maximumf>, %247, %cst_107 [1] : vector<16x16xf32> to vector<16xf32>
    %249 = vector.shape_cast %248 : vector<16xf32> to vector<16x1xf32>
    %250 = vector.broadcast %249 : vector<16x1xf32> to vector<16x16xf32>
    %251 = arith.subf %247, %250 : vector<16x16xf32>
    %252 = math.exp %251 : vector<16x16xf32>
    %cst_108 = arith.constant dense<0.000000e+00> : vector<16xf32>
    %253 = vector.multi_reduction <add>, %252, %cst_108 [1] : vector<16x16xf32> to vector<16xf32>
    %254 = vector.shape_cast %253 : vector<16xf32> to vector<16x1xf32>
    %255 = tpu.reciprocal %254 {approx = true} : vector<16x1xf32> -> vector<16x1xf32>
    %256 = vector.broadcast %255 : vector<16x1xf32> to vector<16x16xf32>
    %257 = arith.mulf %252, %256 : vector<16x16xf32>
    %258 = arith.truncf %257 : vector<16x16xf32> to vector<16x16xbf16>
    %cst_109 = arith.constant dense<0.000000e+00> : vector<16x16xf32>
    %259 = tpu.matmul %258, %246, %cst_109 {dimension_numbers = #tpu.dot_dimension_numbers<[1], [0], [0], [1], [0, 0, 1, 1], [], []>} : vector<16x16xbf16>, vector<16x16xbf16>, vector<16x16xf32> -> vector<16x16xf32>
    %260 = arith.truncf %259 : vector<16x16xf32> to vector<16x16xbf16>
    %261 = vector.extract_strided_slice %238 {offsets = [0, 0], sizes = [16, 32], strides = [1, 1]} : vector<64x32xbf16> to vector<16x32xbf16>
    %cst_110 = arith.constant dense<0.000000e+00> : vector<16x32xf32>
    %262 = tpu.matmul %260, %261, %cst_110 {dimension_numbers = #tpu.dot_dimension_numbers<[1], [0], [0], [1], [0, 0, 1, 1], [], []>} : vector<16x16xbf16>, vector<16x32xbf16>, vector<16x32xf32> -> vector<16x32xf32>
    %263 = vector.extract_strided_slice %236 {offsets = [0, 16], sizes = [16, 16], strides = [1, 1]} : vector<16x192xf32> to vector<16x16xf32>
    %cst_111 = arith.constant 2.500000e-01 : f32
    %264 = vector.broadcast %cst_111 : f32 to vector<16x16xf32>
    %265 = arith.mulf %263, %264 : vector<16x16xf32>
    %266 = arith.truncf %265 : vector<16x16xf32> to vector<16x16xbf16>
    %267 = vector.extract_strided_slice %236 {offsets = [0, 80], sizes = [16, 16], strides = [1, 1]} : vector<16x192xf32> to vector<16x16xf32>
    %268 = arith.truncf %267 : vector<16x16xf32> to vector<16x16xbf16>
    %269 = vector.extract_strided_slice %236 {offsets = [0, 144], sizes = [16, 16], strides = [1, 1]} : vector<16x192xf32> to vector<16x16xf32>
    %270 = arith.truncf %269 : vector<16x16xf32> to vector<16x16xbf16>
    %cst_112 = arith.constant dense<0.000000e+00> : vector<16x16xf32>
    %271 = tpu.matmul %266, %268, %cst_112 {dimension_numbers = #tpu.dot_dimension_numbers<[1], [1], [0], [0], [0, 0, 1, 0], [], []>} : vector<16x16xbf16>, vector<16x16xbf16>, vector<16x16xf32> -> vector<16x16xf32>
    %cst_113 = arith.constant dense<0xFF800000> : vector<16xf32>
    %272 = vector.multi_reduction <maximumf>, %271, %cst_113 [1] : vector<16x16xf32> to vector<16xf32>
    %273 = vector.shape_cast %272 : vector<16xf32> to vector<16x1xf32>
    %274 = vector.broadcast %273 : vector<16x1xf32> to vector<16x16xf32>
    %275 = arith.subf %271, %274 : vector<16x16xf32>
    %276 = math.exp %275 : vector<16x16xf32>
    %cst_114 = arith.constant dense<0.000000e+00> : vector<16xf32>
    %277 = vector.multi_reduction <add>, %276, %cst_114 [1] : vector<16x16xf32> to vector<16xf32>
    %278 = vector.shape_cast %277 : vector<16xf32> to vector<16x1xf32>
    %279 = tpu.reciprocal %278 {approx = true} : vector<16x1xf32> -> vector<16x1xf32>
    %280 = vector.broadcast %279 : vector<16x1xf32> to vector<16x16xf32>
    %281 = arith.mulf %276, %280 : vector<16x16xf32>
    %282 = arith.truncf %281 : vector<16x16xf32> to vector<16x16xbf16>
    %cst_115 = arith.constant dense<0.000000e+00> : vector<16x16xf32>
    %283 = tpu.matmul %282, %270, %cst_115 {dimension_numbers = #tpu.dot_dimension_numbers<[1], [0], [0], [1], [0, 0, 1, 1], [], []>} : vector<16x16xbf16>, vector<16x16xbf16>, vector<16x16xf32> -> vector<16x16xf32>
    %284 = arith.truncf %283 : vector<16x16xf32> to vector<16x16xbf16>
    %285 = vector.extract_strided_slice %238 {offsets = [16, 0], sizes = [16, 32], strides = [1, 1]} : vector<64x32xbf16> to vector<16x32xbf16>
    %cst_116 = arith.constant dense<0.000000e+00> : vector<16x32xf32>
    %286 = tpu.matmul %284, %285, %cst_116 {dimension_numbers = #tpu.dot_dimension_numbers<[1], [0], [0], [1], [0, 0, 1, 1], [], []>} : vector<16x16xbf16>, vector<16x32xbf16>, vector<16x32xf32> -> vector<16x32xf32>
    %287 = arith.addf %262, %286 : vector<16x32xf32>
    %288 = vector.extract_strided_slice %236 {offsets = [0, 32], sizes = [16, 16], strides = [1, 1]} : vector<16x192xf32> to vector<16x16xf32>
    %cst_117 = arith.constant 2.500000e-01 : f32
    %289 = vector.broadcast %cst_117 : f32 to vector<16x16xf32>
    %290 = arith.mulf %288, %289 : vector<16x16xf32>
    %291 = arith.truncf %290 : vector<16x16xf32> to vector<16x16xbf16>
    %292 = vector.extract_strided_slice %236 {offsets = [0, 96], sizes = [16, 16], strides = [1, 1]} : vector<16x192xf32> to vector<16x16xf32>
    %293 = arith.truncf %292 : vector<16x16xf32> to vector<16x16xbf16>
    %294 = vector.extract_strided_slice %236 {offsets = [0, 160], sizes = [16, 16], strides = [1, 1]} : vector<16x192xf32> to vector<16x16xf32>
    %295 = arith.truncf %294 : vector<16x16xf32> to vector<16x16xbf16>
    %cst_118 = arith.constant dense<0.000000e+00> : vector<16x16xf32>
    %296 = tpu.matmul %291, %293, %cst_118 {dimension_numbers = #tpu.dot_dimension_numbers<[1], [1], [0], [0], [0, 0, 1, 0], [], []>} : vector<16x16xbf16>, vector<16x16xbf16>, vector<16x16xf32> -> vector<16x16xf32>
    %cst_119 = arith.constant dense<0xFF800000> : vector<16xf32>
    %297 = vector.multi_reduction <maximumf>, %296, %cst_119 [1] : vector<16x16xf32> to vector<16xf32>
    %298 = vector.shape_cast %297 : vector<16xf32> to vector<16x1xf32>
    %299 = vector.broadcast %298 : vector<16x1xf32> to vector<16x16xf32>
    %300 = arith.subf %296, %299 : vector<16x16xf32>
    %301 = math.exp %300 : vector<16x16xf32>
    %cst_120 = arith.constant dense<0.000000e+00> : vector<16xf32>
    %302 = vector.multi_reduction <add>, %301, %cst_120 [1] : vector<16x16xf32> to vector<16xf32>
    %303 = vector.shape_cast %302 : vector<16xf32> to vector<16x1xf32>
    %304 = tpu.reciprocal %303 {approx = true} : vector<16x1xf32> -> vector<16x1xf32>
    %305 = vector.broadcast %304 : vector<16x1xf32> to vector<16x16xf32>
    %306 = arith.mulf %301, %305 : vector<16x16xf32>
    %307 = arith.truncf %306 : vector<16x16xf32> to vector<16x16xbf16>
    %cst_121 = arith.constant dense<0.000000e+00> : vector<16x16xf32>
    %308 = tpu.matmul %307, %295, %cst_121 {dimension_numbers = #tpu.dot_dimension_numbers<[1], [0], [0], [1], [0, 0, 1, 1], [], []>} : vector<16x16xbf16>, vector<16x16xbf16>, vector<16x16xf32> -> vector<16x16xf32>
    %309 = arith.truncf %308 : vector<16x16xf32> to vector<16x16xbf16>
    %310 = vector.extract_strided_slice %238 {offsets = [32, 0], sizes = [16, 32], strides = [1, 1]} : vector<64x32xbf16> to vector<16x32xbf16>
    %cst_122 = arith.constant dense<0.000000e+00> : vector<16x32xf32>
    %311 = tpu.matmul %309, %310, %cst_122 {dimension_numbers = #tpu.dot_dimension_numbers<[1], [0], [0], [1], [0, 0, 1, 1], [], []>} : vector<16x16xbf16>, vector<16x32xbf16>, vector<16x32xf32> -> vector<16x32xf32>
    %312 = arith.addf %287, %311 : vector<16x32xf32>
    %313 = vector.extract_strided_slice %236 {offsets = [0, 48], sizes = [16, 16], strides = [1, 1]} : vector<16x192xf32> to vector<16x16xf32>
    %cst_123 = arith.constant 2.500000e-01 : f32
    %314 = vector.broadcast %cst_123 : f32 to vector<16x16xf32>
    %315 = arith.mulf %313, %314 : vector<16x16xf32>
    %316 = arith.truncf %315 : vector<16x16xf32> to vector<16x16xbf16>
    %317 = vector.extract_strided_slice %236 {offsets = [0, 112], sizes = [16, 16], strides = [1, 1]} : vector<16x192xf32> to vector<16x16xf32>
    %318 = arith.truncf %317 : vector<16x16xf32> to vector<16x16xbf16>
    %319 = vector.extract_strided_slice %236 {offsets = [0, 176], sizes = [16, 16], strides = [1, 1]} : vector<16x192xf32> to vector<16x16xf32>
    %320 = arith.truncf %319 : vector<16x16xf32> to vector<16x16xbf16>
    %cst_124 = arith.constant dense<0.000000e+00> : vector<16x16xf32>
    %321 = tpu.matmul %316, %318, %cst_124 {dimension_numbers = #tpu.dot_dimension_numbers<[1], [1], [0], [0], [0, 0, 1, 0], [], []>} : vector<16x16xbf16>, vector<16x16xbf16>, vector<16x16xf32> -> vector<16x16xf32>
    %cst_125 = arith.constant dense<0xFF800000> : vector<16xf32>
    %322 = vector.multi_reduction <maximumf>, %321, %cst_125 [1] : vector<16x16xf32> to vector<16xf32>
    %323 = vector.shape_cast %322 : vector<16xf32> to vector<16x1xf32>
    %324 = vector.broadcast %323 : vector<16x1xf32> to vector<16x16xf32>
    %325 = arith.subf %321, %324 : vector<16x16xf32>
    %326 = math.exp %325 : vector<16x16xf32>
    %cst_126 = arith.constant dense<0.000000e+00> : vector<16xf32>
    %327 = vector.multi_reduction <add>, %326, %cst_126 [1] : vector<16x16xf32> to vector<16xf32>
    %328 = vector.shape_cast %327 : vector<16xf32> to vector<16x1xf32>
    %329 = tpu.reciprocal %328 {approx = true} : vector<16x1xf32> -> vector<16x1xf32>
    %330 = vector.broadcast %329 : vector<16x1xf32> to vector<16x16xf32>
    %331 = arith.mulf %326, %330 : vector<16x16xf32>
    %332 = arith.truncf %331 : vector<16x16xf32> to vector<16x16xbf16>
    %cst_127 = arith.constant dense<0.000000e+00> : vector<16x16xf32>
    %333 = tpu.matmul %332, %320, %cst_127 {dimension_numbers = #tpu.dot_dimension_numbers<[1], [0], [0], [1], [0, 0, 1, 1], [], []>} : vector<16x16xbf16>, vector<16x16xbf16>, vector<16x16xf32> -> vector<16x16xf32>
    %334 = arith.truncf %333 : vector<16x16xf32> to vector<16x16xbf16>
    %335 = vector.extract_strided_slice %238 {offsets = [48, 0], sizes = [16, 32], strides = [1, 1]} : vector<64x32xbf16> to vector<16x32xbf16>
    %cst_128 = arith.constant dense<0.000000e+00> : vector<16x32xf32>
    %336 = tpu.matmul %334, %335, %cst_128 {dimension_numbers = #tpu.dot_dimension_numbers<[1], [0], [0], [1], [0, 0, 1, 1], [], []>} : vector<16x16xbf16>, vector<16x32xbf16>, vector<16x32xf32> -> vector<16x32xf32>
    %337 = arith.addf %312, %336 : vector<16x32xf32>
    %338 = arith.addf %206, %337 : vector<16x32xf32>
    %c1_129 = arith.constant 1 : index
    %c0_130 = arith.constant 0 : index
    %c0_131 = arith.constant 0 : index
    %339 = vector.load %arg11[%c1_129, %c0_130, %c0_131] : memref<2x1x32xf32, #tpu.memory_space<vmem>>, vector<1x1x32xf32>
    %340 = vector.shape_cast %339 : vector<1x1x32xf32> to vector<1x32xf32>
    %341 = vector.broadcast %340 : vector<1x32xf32> to vector<16x32xf32>
    %342 = arith.addf %338, %341 : vector<16x32xf32>
    %c1_132 = arith.constant 1 : index
    %c0_133 = arith.constant 0 : index
    %c0_134 = arith.constant 0 : index
    %343 = vector.load %arg12[%c1_132, %c0_133, %c0_134] : memref<2x1x32xf32, #tpu.memory_space<vmem>>, vector<1x1x32xf32>
    %344 = vector.shape_cast %343 : vector<1x1x32xf32> to vector<1x32xf32>
    %c1_135 = arith.constant 1 : index
    %c0_136 = arith.constant 0 : index
    %c0_137 = arith.constant 0 : index
    %345 = vector.load %arg13[%c1_135, %c0_136, %c0_137] : memref<2x1x32xf32, #tpu.memory_space<vmem>>, vector<1x1x32xf32>
    %346 = vector.shape_cast %345 : vector<1x1x32xf32> to vector<1x32xf32>
    %cst_138 = arith.constant dense<0.000000e+00> : vector<16xf32>
    %347 = vector.multi_reduction <add>, %342, %cst_138 [1] : vector<16x32xf32> to vector<16xf32>
    %348 = vector.shape_cast %347 : vector<16xf32> to vector<16x1xf32>
    %cst_139 = arith.constant 3.200000e+01 : f32
    %349 = vector.broadcast %cst_139 : f32 to vector<16x1xf32>
    %350 = arith.divf %348, %349 : vector<16x1xf32>
    %351 = vector.broadcast %350 : vector<16x1xf32> to vector<16x32xf32>
    %352 = arith.subf %342, %351 : vector<16x32xf32>
    %353 = arith.mulf %352, %352 : vector<16x32xf32>
    %cst_140 = arith.constant dense<0.000000e+00> : vector<16xf32>
    %354 = vector.multi_reduction <add>, %353, %cst_140 [1] : vector<16x32xf32> to vector<16xf32>
    %355 = vector.shape_cast %354 : vector<16xf32> to vector<16x1xf32>
    %cst_141 = arith.constant 3.200000e+01 : f32
    %356 = vector.broadcast %cst_141 : f32 to vector<16x1xf32>
    %357 = arith.divf %355, %356 : vector<16x1xf32>
    %358 = vector.broadcast %350 : vector<16x1xf32> to vector<16x32xf32>
    %359 = arith.subf %342, %358 : vector<16x32xf32>
    %cst_142 = arith.constant 9.99999974E-6 : f32
    %360 = vector.broadcast %cst_142 : f32 to vector<16x1xf32>
    %361 = arith.addf %357, %360 : vector<16x1xf32>
    %362 = math.rsqrt %361 : vector<16x1xf32>
    %363 = vector.broadcast %362 : vector<16x1xf32> to vector<16x32xf32>
    %364 = arith.mulf %359, %363 : vector<16x32xf32>
    %365 = vector.broadcast %344 : vector<1x32xf32> to vector<16x32xf32>
    %366 = arith.mulf %364, %365 : vector<16x32xf32>
    %367 = vector.broadcast %346 : vector<1x32xf32> to vector<16x32xf32>
    %368 = arith.addf %366, %367 : vector<16x32xf32>
    %369 = arith.truncf %368 : vector<16x32xf32> to vector<16x32xbf16>
    %c1_143 = arith.constant 1 : index
    %c0_144 = arith.constant 0 : index
    %c0_145 = arith.constant 0 : index
    %370 = vector.load %arg14[%c1_143, %c0_144, %c0_145] : memref<2x32x128xbf16, #tpu.memory_space<vmem>>, vector<1x32x128xbf16>
    %371 = vector.shape_cast %370 : vector<1x32x128xbf16> to vector<32x128xbf16>
    %cst_146 = arith.constant dense<0.000000e+00> : vector<16x128xf32>
    %372 = tpu.matmul %369, %371, %cst_146 {dimension_numbers = #tpu.dot_dimension_numbers<[1], [0], [0], [1], [0, 0, 1, 1], [], []>} : vector<16x32xbf16>, vector<32x128xbf16>, vector<16x128xf32> -> vector<16x128xf32>
    %c1_147 = arith.constant 1 : index
    %c0_148 = arith.constant 0 : index
    %c0_149 = arith.constant 0 : index
    %373 = vector.load %arg15[%c1_147, %c0_148, %c0_149] : memref<2x1x128xf32, #tpu.memory_space<vmem>>, vector<1x1x128xf32>
    %374 = vector.shape_cast %373 : vector<1x1x128xf32> to vector<1x128xf32>
    %375 = vector.broadcast %374 : vector<1x128xf32> to vector<16x128xf32>
    %376 = arith.addf %372, %375 : vector<16x128xf32>
    %377 = arith.mulf %376, %376 : vector<16x128xf32>
    %378 = arith.mulf %376, %377 : vector<16x128xf32>
    %cst_150 = arith.constant 4.471500e-02 : f32
    %379 = vector.broadcast %cst_150 : f32 to vector<16x128xf32>
    %380 = arith.mulf %379, %378 : vector<16x128xf32>
    %381 = arith.addf %376, %380 : vector<16x128xf32>
    %cst_151 = arith.constant 0.797884583 : f32
    %382 = vector.broadcast %cst_151 : f32 to vector<16x128xf32>
    %383 = arith.mulf %382, %381 : vector<16x128xf32>
    %384 = math.tanh %383 : vector<16x128xf32>
    %cst_152 = arith.constant 1.000000e+00 : f32
    %385 = vector.broadcast %cst_152 : f32 to vector<16x128xf32>
    %386 = arith.addf %385, %384 : vector<16x128xf32>
    %cst_153 = arith.constant 5.000000e-01 : f32
    %387 = vector.broadcast %cst_153 : f32 to vector<16x128xf32>
    %388 = arith.mulf %387, %386 : vector<16x128xf32>
    %389 = arith.mulf %376, %388 : vector<16x128xf32>
    %390 = arith.truncf %389 : vector<16x128xf32> to vector<16x128xbf16>
    %c1_154 = arith.constant 1 : index
    %c0_155 = arith.constant 0 : index
    %c0_156 = arith.constant 0 : index
    %391 = vector.load %arg16[%c1_154, %c0_155, %c0_156] : memref<2x128x32xbf16, #tpu.memory_space<vmem>>, vector<1x128x32xbf16>
    %392 = vector.shape_cast %391 : vector<1x128x32xbf16> to vector<128x32xbf16>
    %cst_157 = arith.constant dense<0.000000e+00> : vector<16x32xf32>
    %393 = tpu.matmul %390, %392, %cst_157 {dimension_numbers = #tpu.dot_dimension_numbers<[1], [0], [0], [1], [0, 0, 1, 1], [], []>} : vector<16x128xbf16>, vector<128x32xbf16>, vector<16x32xf32> -> vector<16x32xf32>
    %394 = arith.addf %342, %393 : vector<16x32xf32>
    %c1_158 = arith.constant 1 : index
    %c0_159 = arith.constant 0 : index
    %c0_160 = arith.constant 0 : index
    %395 = vector.load %arg17[%c1_158, %c0_159, %c0_160] : memref<2x1x32xf32, #tpu.memory_space<vmem>>, vector<1x1x32xf32>
    %396 = vector.shape_cast %395 : vector<1x1x32xf32> to vector<1x32xf32>
    %397 = vector.broadcast %396 : vector<1x32xf32> to vector<16x32xf32>
    %398 = arith.addf %394, %397 : vector<16x32xf32>
    %399 = vector.extract_strided_slice %398 {offsets = [7, 0], sizes = [1, 32], strides = [1, 1]} : vector<16x32xf32> to vector<1x32xf32>
    %400 = vector.extract_strided_slice %398 {offsets = [15, 0], sizes = [1, 32], strides = [1, 1]} : vector<16x32xf32> to vector<1x32xf32>
    %401 = arith.truncf %399 : vector<1x32xf32> to vector<1x32xbf16>
    %c0_161 = arith.constant 0 : index
    %c0_162 = arith.constant 0 : index
    %402 = vector.load %arg18[%c0_161, %c0_162] : memref<32x128xbf16, #tpu.memory_space<vmem>>, vector<32x128xbf16>
    %cst_163 = arith.constant dense<0.000000e+00> : vector<1x128xf32>
    %403 = tpu.matmul %401, %402, %cst_163 {dimension_numbers = #tpu.dot_dimension_numbers<[1], [0], [0], [1], [0, 0, 1, 1], [], []>} : vector<1x32xbf16>, vector<32x128xbf16>, vector<1x128xf32> -> vector<1x128xf32>
    %404 = arith.truncf %400 : vector<1x32xf32> to vector<1x32xbf16>
    %c0_164 = arith.constant 0 : index
    %c0_165 = arith.constant 0 : index
    %405 = vector.load %arg19[%c0_164, %c0_165] : memref<32x128xbf16, #tpu.memory_space<vmem>>, vector<32x128xbf16>
    %cst_166 = arith.constant dense<0.000000e+00> : vector<1x128xf32>
    %406 = tpu.matmul %404, %405, %cst_166 {dimension_numbers = #tpu.dot_dimension_numbers<[1], [0], [0], [1], [0, 0, 1, 1], [], []>} : vector<1x32xbf16>, vector<32x128xbf16>, vector<1x128xf32> -> vector<1x128xf32>
    %407 = arith.addf %403, %406 : vector<1x128xf32>
    %c0_167 = arith.constant 0 : index
    %c0_168 = arith.constant 0 : index
    %408 = vector.load %arg20[%c0_167, %c0_168] : memref<1x128xf32, #tpu.memory_space<vmem>>, vector<1x128xf32>
    %409 = arith.addf %407, %408 : vector<1x128xf32>
    %cst_169 = arith.constant 0.000000e+00 : f32
    %410 = vector.broadcast %cst_169 : f32 to vector<1x128xf32>
    %411 = arith.subf %410, %409 : vector<1x128xf32>
    %412 = math.exp %411 : vector<1x128xf32>
    %cst_170 = arith.constant 1.000000e+00 : f32
    %413 = vector.broadcast %cst_170 : f32 to vector<1x128xf32>
    %414 = arith.addf %413, %412 : vector<1x128xf32>
    %cst_171 = arith.constant 1.000000e+00 : f32
    %415 = vector.broadcast %cst_171 : f32 to vector<1x128xf32>
    %416 = arith.divf %415, %414 : vector<1x128xf32>
    %417 = arith.mulf %409, %416 : vector<1x128xf32>
    %418 = arith.truncf %417 : vector<1x128xf32> to vector<1x128xbf16>
    %c0_172 = arith.constant 0 : index
    %c0_173 = arith.constant 0 : index
    %419 = vector.load %arg21[%c0_172, %c0_173] : memref<128x4xbf16, #tpu.memory_space<vmem>>, vector<128x4xbf16>
    %cst_174 = arith.constant dense<0.000000e+00> : vector<1x4xf32>
    %420 = tpu.matmul %418, %419, %cst_174 {dimension_numbers = #tpu.dot_dimension_numbers<[1], [0], [0], [1], [0, 0, 1, 1], [], []>} : vector<1x128xbf16>, vector<128x4xbf16>, vector<1x4xf32> -> vector<1x4xf32>
    %c0_175 = arith.constant 0 : index
    %c0_176 = arith.constant 0 : index
    %421 = vector.load %arg22[%c0_175, %c0_176] : memref<1x4xf32, #tpu.memory_space<vmem>>, vector<1x4xf32>
    %422 = arith.addf %420, %421 : vector<1x4xf32>
    %c0_177 = arith.constant 0 : index
    %c0_178 = arith.constant 0 : index
    %c0_179 = arith.constant 0 : index
    %423 = vector.load %arg23[%c0_177, %c0_178, %c0_179] : memref<1x1x4xf32, #tpu.memory_space<vmem>>, vector<1x1x4xf32>
    %424 = vector.shape_cast %423 : vector<1x1x4xf32> to vector<1x4xf32>
    %425 = vector.shape_cast %422 : vector<1x4xf32> to vector<1x1x4xf32>
    tpu.vector_store %arg23[%c0_177, %c0_178, %c0_179], %425 {strides = array<i32>} : memref<1x1x4xf32, #tpu.memory_space<vmem>>, vector<1x1x4xf32>,
    return
  }
  func.func @transform_0(%arg0: i32) -> (i32, i32, i32) {
    %c0_i32 = arith.constant 0 : i32
    %c0_i32_0 = arith.constant 0 : i32
    %c0_i32_1 = arith.constant 0 : i32
    return %arg0, %c0_i32, %c0_i32_0 : i32, i32, i32
  }
  func.func @transform_1(%arg0: i32) -> (i32, i32, i32) {
    %c0_i32 = arith.constant 0 : i32
    %c0_i32_0 = arith.constant 0 : i32
    %c0_i32_1 = arith.constant 0 : i32
    return %arg0, %c0_i32, %c0_i32_0 : i32, i32, i32
  }
  func.func @transform_2(%arg0: i32) -> (i32, i32) {
    %c0_i32 = arith.constant 0 : i32
    %c0_i32_0 = arith.constant 0 : i32
    %c0_i32_1 = arith.constant 0 : i32
    return %c0_i32, %c0_i32_0 : i32, i32
  }
  func.func @transform_3(%arg0: i32) -> (i32, i32) {
    %c0_i32 = arith.constant 0 : i32
    %c0_i32_0 = arith.constant 0 : i32
    %c0_i32_1 = arith.constant 0 : i32
    return %c0_i32, %c0_i32_0 : i32, i32
  }
  func.func @transform_4(%arg0: i32) -> (i32, i32) {
    %c0_i32 = arith.constant 0 : i32
    %c0_i32_0 = arith.constant 0 : i32
    %c0_i32_1 = arith.constant 0 : i32
    return %c0_i32, %c0_i32_0 : i32, i32
  }
  func.func @transform_5(%arg0: i32) -> (i32, i32) {
    %c0_i32 = arith.constant 0 : i32
    %c0_i32_0 = arith.constant 0 : i32
    %c0_i32_1 = arith.constant 0 : i32
    return %c0_i32, %c0_i32_0 : i32, i32
  }
  func.func @transform_6(%arg0: i32) -> (i32, i32, i32) {
    %c0_i32 = arith.constant 0 : i32
    %c0_i32_0 = arith.constant 0 : i32
    %c0_i32_1 = arith.constant 0 : i32
    %c0_i32_2 = arith.constant 0 : i32
    return %c0_i32, %c0_i32_0, %c0_i32_1 : i32, i32, i32
  }
  func.func @transform_7(%arg0: i32) -> (i32, i32, i32) {
    %c0_i32 = arith.constant 0 : i32
    %c0_i32_0 = arith.constant 0 : i32
    %c0_i32_1 = arith.constant 0 : i32
    %c0_i32_2 = arith.constant 0 : i32
    return %c0_i32, %c0_i32_0, %c0_i32_1 : i32, i32, i32
  }
  func.func @transform_8(%arg0: i32) -> (i32, i32, i32) {
    %c0_i32 = arith.constant 0 : i32
    %c0_i32_0 = arith.constant 0 : i32
    %c0_i32_1 = arith.constant 0 : i32
    %c0_i32_2 = arith.constant 0 : i32
    return %c0_i32, %c0_i32_0, %c0_i32_1 : i32, i32, i32
  }
  func.func @transform_9(%arg0: i32) -> (i32, i32, i32) {
    %c0_i32 = arith.constant 0 : i32
    %c0_i32_0 = arith.constant 0 : i32
    %c0_i32_1 = arith.constant 0 : i32
    %c0_i32_2 = arith.constant 0 : i32
    return %c0_i32, %c0_i32_0, %c0_i32_1 : i32, i32, i32
  }
  func.func @transform_10(%arg0: i32) -> (i32, i32, i32) {
    %c0_i32 = arith.constant 0 : i32
    %c0_i32_0 = arith.constant 0 : i32
    %c0_i32_1 = arith.constant 0 : i32
    %c0_i32_2 = arith.constant 0 : i32
    return %c0_i32, %c0_i32_0, %c0_i32_1 : i32, i32, i32
  }
  func.func @transform_11(%arg0: i32) -> (i32, i32, i32) {
    %c0_i32 = arith.constant 0 : i32
    %c0_i32_0 = arith.constant 0 : i32
    %c0_i32_1 = arith.constant 0 : i32
    %c0_i32_2 = arith.constant 0 : i32
    return %c0_i32, %c0_i32_0, %c0_i32_1 : i32, i32, i32
  }
  func.func @transform_12(%arg0: i32) -> (i32, i32, i32) {
    %c0_i32 = arith.constant 0 : i32
    %c0_i32_0 = arith.constant 0 : i32
    %c0_i32_1 = arith.constant 0 : i32
    %c0_i32_2 = arith.constant 0 : i32
    return %c0_i32, %c0_i32_0, %c0_i32_1 : i32, i32, i32
  }
  func.func @transform_13(%arg0: i32) -> (i32, i32, i32) {
    %c0_i32 = arith.constant 0 : i32
    %c0_i32_0 = arith.constant 0 : i32
    %c0_i32_1 = arith.constant 0 : i32
    %c0_i32_2 = arith.constant 0 : i32
    return %c0_i32, %c0_i32_0, %c0_i32_1 : i32, i32, i32
  }
  func.func @transform_14(%arg0: i32) -> (i32, i32, i32) {
    %c0_i32 = arith.constant 0 : i32
    %c0_i32_0 = arith.constant 0 : i32
    %c0_i32_1 = arith.constant 0 : i32
    %c0_i32_2 = arith.constant 0 : i32
    return %c0_i32, %c0_i32_0, %c0_i32_1 : i32, i32, i32
  }
  func.func @transform_15(%arg0: i32) -> (i32, i32, i32) {
    %c0_i32 = arith.constant 0 : i32
    %c0_i32_0 = arith.constant 0 : i32
    %c0_i32_1 = arith.constant 0 : i32
    %c0_i32_2 = arith.constant 0 : i32
    return %c0_i32, %c0_i32_0, %c0_i32_1 : i32, i32, i32
  }
  func.func @transform_16(%arg0: i32) -> (i32, i32, i32) {
    %c0_i32 = arith.constant 0 : i32
    %c0_i32_0 = arith.constant 0 : i32
    %c0_i32_1 = arith.constant 0 : i32
    %c0_i32_2 = arith.constant 0 : i32
    return %c0_i32, %c0_i32_0, %c0_i32_1 : i32, i32, i32
  }
  func.func @transform_17(%arg0: i32) -> (i32, i32) {
    %c0_i32 = arith.constant 0 : i32
    %c0_i32_0 = arith.constant 0 : i32
    %c0_i32_1 = arith.constant 0 : i32
    return %c0_i32, %c0_i32_0 : i32, i32
  }
  func.func @transform_18(%arg0: i32) -> (i32, i32) {
    %c0_i32 = arith.constant 0 : i32
    %c0_i32_0 = arith.constant 0 : i32
    %c0_i32_1 = arith.constant 0 : i32
    return %c0_i32, %c0_i32_0 : i32, i32
  }
  func.func @transform_19(%arg0: i32) -> (i32, i32) {
    %c0_i32 = arith.constant 0 : i32
    %c0_i32_0 = arith.constant 0 : i32
    %c0_i32_1 = arith.constant 0 : i32
    return %c0_i32, %c0_i32_0 : i32, i32
  }
  func.func @transform_20(%arg0: i32) -> (i32, i32) {
    %c0_i32 = arith.constant 0 : i32
    %c0_i32_0 = arith.constant 0 : i32
    %c0_i32_1 = arith.constant 0 : i32
    return %c0_i32, %c0_i32_0 : i32, i32
  }
  func.func @transform_21(%arg0: i32) -> (i32, i32) {
    %c0_i32 = arith.constant 0 : i32
    %c0_i32_0 = arith.constant 0 : i32
    %c0_i32_1 = arith.constant 0 : i32
    return %c0_i32, %c0_i32_0 : i32, i32
  }
  func.func @transform_22(%arg0: i32) -> (i32, i32, i32) {
    %c0_i32 = arith.constant 0 : i32
    %c0_i32_0 = arith.constant 0 : i32
    %c0_i32_1 = arith.constant 0 : i32
    return %arg0, %c0_i32, %c0_i32_0 : i32, i32, i32
  }
}

</mosaic_0001>

<bundles_post_ra>
// kernel: tpu_custom_call.1
= control target key start
LH: loop header
LB: loop body
LE: loop exit
PB: predicated region body
PF: predicated region fallthrough
CT: control target
= control target key end

     0   :  { %s3614_s0 = inlined_call_operand.vmem [shape: f32[2,8,11], index: 0, kind: input, shape index: {}]   ;;  %s3615_s1 = inlined_call_operand.vmem [shape: f32[2,8,3], index: 1, kind: input, shape index: {}]   ;;  %s3616_s2 = inlined_call_operand.vmem [shape: bf16[11,32], index: 2, kind: input, shape index: {}]   ;;  %s3617_s3 = inlined_call_operand.vmem [shape: f32[8,32], index: 3, kind: input, shape index: {}]   ;;  %s3618_s4 = inlined_call_operand.vmem [shape: bf16[3,32], index: 4, kind: input, shape index: {}]   ;;  %s3619_s5 = inlined_call_operand.vmem [shape: f32[8,32], index: 5, kind: input, shape index: {}]   ;;  %s3620_s6 = inlined_call_operand.vmem [shape: f32[2,1,32], index: 6, kind: input, shape index: {}]   ;;  %s3621_s7 = inlined_call_operand.vmem [shape: f32[2,1,32], index: 7, kind: input, shape index: {}]   ;;  %s3622_s8 = inlined_call_operand.vmem [shape: bf16[2,32,192], index: 8, kind: input, shape index: {}]   ;;  %s3623_s9 = inlined_call_operand.vmem [shape: bf16[2,64,32], index: 9, kind: input, shape index: {}]   ;;  %s3624_s10 = inlined_call_operand.vmem [shape: f32[2,1,32], index: 10, kind: input, shape index: {}]   ;;  %s3625_s11 = inlined_call_operand.vmem [shape: f32[2,1,32], index: 11, kind: input, shape index: {}]   ;;  %s3626_s12 = inlined_call_operand.vmem [shape: f32[2,1,32], index: 12, kind: input, shape index: {}]   ;;  %s3627_s13 = inlined_call_operand.vmem [shape: bf16[2,32,128], index: 13, kind: input, shape index: {}]   ;;  %s3628_s14 = inlined_call_operand.vmem [shape: f32[2,1,128], index: 14, kind: input, shape index: {}]   ;;  %s3629_s15 = inlined_call_operand.vmem [shape: bf16[2,128,32], index: 15, kind: input, shape index: {}]   ;;  %s3630_s16 = inlined_call_operand.vmem [shape: f32[2,1,32], index: 16, kind: input, shape index: {}]   ;;  %s3631_s17 = inlined_call_operand.vmem [shape: bf16[32,128], index: 17, kind: input, shape index: {}]   ;;  %s3632_s18 = inlined_call_operand.vmem [shape: bf16[32,128], index: 18, kind: input, shape index: {}]   ;;  %s3633_s19 = inlined_call_operand.vmem [shape: f32[1,128], index: 19, kind: input, shape index: {}]   ;;  %s3634_s20 = inlined_call_operand.vmem [shape: bf16[128,4], index: 20, kind: input, shape index: {}]   ;;  %s3635_s21 = inlined_call_operand.vmem [shape: f32[1,4], index: 21, kind: input, shape index: {}]   ;;  %s3636_s22 = inlined_call_operand.hbm [shape: f32[2,1,4], index: 22, kind: output, shape index: {}]  }
   0x1   :  { %3656 = sst [smem:[#allocation11_spill]] %s3614_s0 }
   0x2   :  { %3657 = sst [smem:[#allocation12_spill]] %s3615_s1 }
   0x3   :  { %3658 = sst [smem:[#allocation13_spill]] %s3616_s2 }
   0x4   :  { %3659 = sst [smem:[#allocation14_spill]] %s3617_s3 }
   0x5   :  { %3660 = sst [smem:[#allocation15_spill]] %s3618_s4 }
   0x6   :  { %3661 = sst [smem:[#allocation16_spill]] %s3619_s5 }
   0x7   :  { %3662 = sst [smem:[#allocation17_spill]] %s3620_s6 }
   0x8   :  { %3663 = sst [smem:[#allocation18_spill]] %s3621_s7 }
   0x9   :  { %27 = vsyncpa [#allocation3], 0 }
   0xa   :  { %29 = vsyncpa [#allocation3 + $0x1], 0  ;;  %s3101_s3 = smov 0   ;;  %s3103_s28 = smov 0  }
   0xb   :  { %s3105_s29 = smov 0   ;;  %s3107_s30 = smov 0  }
   0xc LB: > { %3664 = sst [smem:[#allocation5_spill]] %s2963_s3  ;;  %s3122_s4 = sadd.s32 4294967295, %s2975_s30   ;;  %s2975_s30 = sphi %s3107_s30, %s3690_s30   ;;  %s2971_s29 = sphi %s3105_s29, %s3692_s29   ;;  %s2967_s28 = sphi %s3103_s28, %s3694_s28   ;;  %s2963_s3 = sphi %s3101_s3, %s3693_s3  }
   0xd   : > { %3665 = sst [smem:[#allocation6_spill]] %s2971_s29  ;;  %s2431_s0 = sadd.s32 4294967294, %s2975_s30  }
   0xe   : > { %3666 = sst [smem:[#allocation7_spill]] %s2975_s30  ;;  %s3126_s23 = sadd.s32 1, %s2975_s30  }
   0xf   : > { %3667 = sst [smem:[#allocation8_spill]] %s3126_s23  ;;  %s514_s1 = sadd.s32 1, %s2971_s29 }
  0x10   : > { %s511_s5 = ssub.s32 %s2975_s30, %s3126_s23  ;;  %p524_p0 = scmp.ne.s32.totalorder %s2971_s29, %s2967_s28 }
  0x11   : > { %p512_p1 = scmp.eq.s32.totalorder %s511_s5, 0  ;;  %p525_p2 = scmp.eq.s32.totalorder %s3122_s4, 1 }
  0x12   : > { %p530_p3 = scmp.ne.s32.totalorder %s2967_s28, %s2963_s3  ;;  %p531_p4 = scmp.eq.s32.totalorder %s2431_s0, 1 }
  0x13   : > { %s3137_s24 = scalar_select %p512_p1, %s2971_s29, %s514_s1  }
  0x14   : > { %p3139_p5 = por %p525_p2, %p524_p0  ;;  %p3143_p6 = por %p531_p4, %p530_p3 }
  0x15   : > { %3668 = sst [smem:[#allocation9_spill]] %s3137_s24  ;;  %p2434_p7 = scmp.ge.s32.totalorder %s2975_s30, 1 }
  0x16   : > { %s3670_s25 = scalar_select %p3143_p6, 1, 0 }
  0x17   : > { %p623_p8 = scmp.lt.s32.totalorder %s2975_s30, 3 }
  0x18   : > { %3671 = sst [smem:[#allocation10_spill]] %s3670_s25 }
  0x19   : > { %p624_p9 = pnand %p2434_p7, %p623_p8 }
  0x1a   : > { %s3672_s27 = sld [smem:[#allocation13_spill]] (!%p624_p9)  ;;  %p687_p10 = scmp.lt.s32.totalorder (!%p624_p9), %s3122_s4, 1 }
  0x1b   : > { %627 = sbr.rel (%p624_p9) target bundleno = 5134 (0x140e), region = 108  ;;  %s3673_s29 = sld [smem:[#allocation15_spill]] (!%p624_p9) }
  0x1c   : > { %s3675_s5 = sld [smem:[#allocation12_spill]] (!%p624_p9)  ;;  %s3650_s3 = smov (!%p624_p9), 48  }
  0x1d   : > { %s3676_s30 = sld [smem:[#allocation14_spill]] (!%p624_p9)  ;;  %s3646_s0 = smov (!%p624_p9), 96  }
  0x1e   : > { %s3680_s7 = sld [smem:[#allocation18_spill]] (!%p624_p9)  ;;  %s3651_s1 = smov (!%p624_p9), 80  }
  0x1f   : > { %s3686_s24 = smov (!%p624_p9), 96  }
  0x20   : > { %v2439_v0 = vld [vmem:[%s3672_s27] sm:$0xf]  ;;  %v2708_v1 = vld [vmem:[%s3672_s27] sm:$0x30]  ;;  %vm710_vm0 = vcmask 1044480   ;;  %vm711_vm1 = vcmask 1045504  }
  0x21   : > { %v2440_v2 = vor.u32 %v2708_v1, %v2439_v0  ;;  %v732_v3 = vld [vmem:[%s3673_s29] sm:$0x3]  ;;  %vm738_vm2 = vcmask 1040384   ;;  %vm739_vm3 = vcmask 1041408   ;;  %v2977_v4 = vmov 65535   ;;  %s688_s26 = scalar_select %p687_p10, %s3122_s4, 1 }
  0x22   : > { %v712_v5 = vsel %vm710_vm0, 4294967295, %v2977_v4  ;;  %v740_v6 = vsel %vm738_vm2, 4294967295, %v2977_v4  ;;  %s3674_s27 = sld [smem:[#allocation11_spill]]  ;;  %vm706_vm4 = vcmask 89088   ;;  %vm734_vm5 = vcmask 23552  }
  0x23   : > { %v713_v7 = vsel %vm711_vm1, %v712_v5, 0  ;;  %v741_v8 = vsel %vm739_vm3, %v740_v6, 0  ;;  %s2435_s2 = sshll.u32 %s688_s26, 3  ;;  %v700_v15 = vld [vmem:[%s3676_s30] sm:$0xff]  ;;  %vm760_vm6 = vcmask 261120   ;;  %v2978_v25 = vmov 32.0  }
  0x24   : > { %v715_v9 = vand.u32 %v2440_v2, %v713_v7  ;;  %v743_v10 = vand.u32 %v741_v8, %v732_v3  ;;  %s694_s25 = scalar_lea.vmem %s3675_s5, %s2435_s2  ;;  %2819 = vrcp.f32 %v2978_v25  ;;  %v2453_v42 = vld [vmem:[%s3622_s8 + $0x10] sm:$0xf]  ;;  %v2712_v43 = vld [vmem:[%s3622_s8 + $0x14] sm:$0xf0]  ;;  %v2711_v44 = vld [vmem:[%s3622_s8 + $0x14] sm:$0xf] }
  0x25   : > { %v730_v12 = vld [vmem:[%s694_s25] sm:$0xff]  ;;  %s3677_s25 = sld [smem:[#allocation16_spill]]  ;;  %v2454_v45 = vor.u32 %v2712_v43, %v2453_v42  ;;  %v2455_v46 = vld [vmem:[%s3622_s8 + $0x18] sm:$0xf0]  ;;  %v2710_v49 = vld [vmem:[%s3622_s8 + $0x4] sm:$0xf0] }
  0x26   : > { %724 = vmatpush.bf16.msra.mxu0 %v715_v9  ;;  %752 = vmatpush.bf16.msra.mxu3 %v743_v10  ;;  %v731_v14 = vpack.c.bf16 %v730_v12, %v730_v12  ;;  %v2458_v47 = vor.u32 %v2711_v44, %v2455_v46  ;;  %v2445_v48 = vld [vmem:[%s3622_s8] sm:$0xf]  ;;  %v2709_v50 = vld [vmem:[%s3622_s8 + $0x4] sm:$0xf]  ;;  %v2447_v53 = vld [vmem:[%s3622_s8 + $0x8] sm:$0xf0] }
  0x27   : > { %856 = vmatpush.bf16.msra.mxu2 %v2454_v45  ;;  %v2446_v52 = vor.u32 %v2710_v49, %v2445_v48  ;;  %v2450_v55 = vor.u32 %v2709_v50, %v2447_v53  ;;  %s3678_s29 = sld [smem:[#allocation17_spill]]  ;;  %vm894_vm14 = vcmask 130048   ;;  %s3648_s30 = smov 112  }
  0x28   : > { %s690_s23 = scalar_lea.vmem %s3674_s27, %s2435_s2  ;;  %s2979_s27 = smov 64  }
  0x29   : > { %v696_v11 = vld [vmem:[%s690_s23] sm:$0xff]  ;;  %2442 = vmatmul.msk.bf16.vlgmr.msra.gmra.mxu3 %vm734_vm5, %v731_v14  ;;  %s3653_s2 = smov 32   ;;  %s3682_s26 = smov 32  }
  0x2a   : > { %v697_v13 = vpack.c.bf16 %v696_v11, %v696_v11  ;;  %v2820_v26 = vpop.eup %2819  ;;  %870 = vmatpush.bf16.msrb.mxu3 %v2458_v47  ;;  %v2806_v14 = vld [vmem:[%s3680_s7] ss:$0 sm:$0xff]  ;;  %s3685_s23 = smov 112  }
  0x2b   : > { %v733_v19 = vld [vmem:[%s3677_s25] sm:$0xff]  ;;  %v768_v27 = vmul.f32 32.0, %v2820_v26  ;;  %vm772_vm7 = vweird.f32 %v2820_v26  ;;  %857 = vmatpush.bf16.msra.mxu2 %v2446_v52  ;;  %s3654_s25 = smov 16  }
  0x2c   : > { %2441 = vmatmul.msk.bf16.vlgmr.msra.gmra.mxu0 %vm706_vm4, %v697_v13  ;;  %v2713_v47 = vld [vmem:[%s3623_s9] sm:$0xff] }
  0x2d   : > { %v769_v28 = vsub.f32 1.0, %v768_v27  ;;  %s3679_s5 = smov %s3678_s29  ;;  %v2805_v9 = vld [vmem:[%s3678_s29] ss:$0 sm:$0xff]  ;;  %s2933_s29 = scalar_lea.hbm %s3636_s22, 2 }
  0x2e   : > { %871 = vmatpush.bf16.msrb.mxu3 %v2450_v55 }
  0x2f   : > { %v770_v29 = vmul.f32 %v2820_v26, %v769_v28 }
  0x31   : > { %v771_v30 = vadd.f32 %v2820_v26, %v770_v29 }
  0x33   : > { %v3180_v31 = vsel %vm772_vm7, %v2820_v26, %v771_v30 }
  0xa9   : > { %v726_v16 = vpop.f32.mrf.mxu0 }
  0xaa   : > { %v3169_v17 = vadd.f32 %v726_v16, %v700_v15 }
  0xac   : > { %v761_v18 = vsel %vm760_vm6, %v3169_v17, 0.0  ;;  %v754_v20 = vpop.f32.mrf.mxu3 }
  0xad   : > { %762 = vadd.xlane.f32.xlu0 %v761_v18  ;;  %v3176_v21 = vadd.f32 %v754_v20, %v733_v19 }
  0xaf   : > { %v764_v23 = vsel %vm760_vm6, %v3176_v21, 0.0 }
  0xb1   : > { %v728_v22 = vpop.f32.mrf.mxu0 }
  0xb4   : > { %v756_v24 = vpop.f32.mrf.mxu3 }
  0xb5   : > { %765 = vadd.xlane.f32.xlu0 %v764_v23 }
 0x120   : > { %v763_v32 = vpop.xlane.xlu0 %762 }
 0x121   : > { %v774_v33 = vmul.f32 %v3180_v31, %v763_v32 }
 0x123   : > { %v776_v34 = vsub.f32 %v3169_v17, %v774_v33 }
 0x125   : > { %v778_v35 = vmul.f32 %v776_v34, %v776_v34 }
 0x127   : > { %v780_v36 = vsel %vm760_vm6, %v778_v35, 0.0 }
 0x128   : > { %781 = vadd.xlane.f32.xlu1 %v780_v36  ;;  %v766_v37 = vpop.xlane.xlu0 %765 }
 0x129   : > { %v775_v38 = vmul.f32 %v3180_v31, %v766_v37 }
 0x12b   : > { %v777_v39 = vsub.f32 %v3176_v21, %v775_v38 }
 0x12d   : > { %v779_v40 = vmul.f32 %v777_v39, %v777_v39 }
 0x12f   : > { %v783_v41 = vsel %vm760_vm6, %v779_v40, 0.0 }
 0x130   : > { %784 = vadd.xlane.f32.xlu1 %v783_v41 }
 0x19b   : > { %v782_v51 = vpop.xlane.xlu1 %781 }
 0x19c   : > { %v786_v54 = vmul.f32 %v782_v51, %v3180_v31 }
 0x19e   : > { %v788_v56 = vadd.f32 1e-05, %v786_v54 }
 0x1a0   : > { %2821 = vrsqrt.f32 %v788_v56  ;;  %vm796_vm9 = vweird.f32 %v788_v56 }
 0x1a3   : > { %v785_v57 = vpop.xlane.xlu1 %784 }
 0x1a4   : > { %v787_v58 = vmul.f32 %v785_v57, %v3180_v31 }
 0x1a6   : > { %v2822_v59 = vpop.eup %2821  ;;  %v789_v60 = vadd.f32 1e-05, %v787_v58 }
 0x1a7   : > { %v791_v61 = vmul.f32 %v2822_v59, %v788_v56  ;;  %vm797_vm8 = vweird.f32 %v2822_v59 }
 0x1a8   : > { %2823 = vrsqrt.f32 %v789_v60  ;;  %vm798_vm10 = vmor %vm796_vm9, %vm797_vm8  ;;  %vm806_vm12 = vweird.f32 %v789_v60 }
 0x1a9   : > { %v792_v62 = vmul.f32 %v2822_v59, %v791_v61 }
 0x1ab   : > { %v793_v63 = vmul.f32 0.5, %v792_v62 }
 0x1ad   : > { %v794_v0 = vsub.f32 1.5, %v793_v63 }
 0x1ae   : > { %v2824_v1 = vpop.eup %2823 }
 0x1af   : > { %v795_v2 = vmul.f32 %v2822_v59, %v794_v0  ;;  %v801_v3 = vmul.f32 %v2824_v1, %v789_v60  ;;  %vm807_vm11 = vweird.f32 %v2824_v1 }
 0x1b0   : > { %vm808_vm13 = vmor %vm806_vm12, %vm807_vm11 }
 0x1b1   : > { %v802_v4 = vmul.f32 %v2824_v1, %v801_v3  ;;  %v799_v5 = vsel %vm798_vm10, %v2822_v59, %v795_v2 }
 0x1b2   : > { %v810_v8 = vmul.f32 %v799_v5, %v776_v34 }
 0x1b3   : > { %v803_v6 = vmul.f32 0.5, %v802_v4 }
 0x1b4   : > { %v815_v13 = vmul.f32 %v2805_v9, %v810_v8 }
 0x1b5   : > { %v804_v7 = vsub.f32 1.5, %v803_v6 }
 0x1b6   : > { %v820_v16 = vadd.f32 %v2806_v14, %v815_v13 }
 0x1b7   : > { %v805_v10 = vmul.f32 %v2824_v1, %v804_v7 }
 0x1b9   : > { %v809_v11 = vsel %vm808_vm13, %v2824_v1, %v805_v10 }
 0x1ba   : > { %v811_v12 = vmul.f32 %v809_v11, %v777_v39 }
 0x1bc   : > { %v816_v15 = vmul.f32 %v2805_v9, %v811_v12 }
 0x1be   : > { %v821_v18 = vadd.f32 %v2806_v14, %v816_v15 }
 0x1c0   : > { %v822_v19 = vpack.c.bf16 %v821_v18, %v820_v16 }
 0x1c2   : > { %2459 = vmatmul.msk.bf16.vlgmr.msra.gmra.mxu2 %vm760_vm6, %v822_v19  ;;  %2460 = vmatmul.msk.bf16.vlgmr.msrb.gmra.mxu3 %vm760_vm6, %v822_v19 }
 0x245   : > { %v859_v20 = vpop.f32.mrf.mxu2  ;;  %v873_v22 = vpop.f32.mrf.mxu3 }
 0x246   : > { %v886_v30 = vmul.f32 0.25, %v859_v20 }
 0x24d   : > { %v861_v23 = vpop.f32.mrf.mxu2  ;;  %v875_v24 = vpop.f32.mrf.mxu3 }
 0x24e   : > { %v889_v25 = vpack.c.bf16 %v861_v23, %v859_v20  ;;  %v3222_v26 = vpack.c.bf16 %v875_v24, %v873_v22  ;;  %v887_v29 = vmul.f32 0.25, %v861_v23 }
 0x250   : > { %948 = vmatpush.bf16.msra.mxu1 %v3222_v26  ;;  %892 = vrot.lane.b32.xlu2 %v889_v25, %s2979_s27  ;;  %v888_v32 = vpack.c.bf16 %v887_v29, %v886_v30 }
 0x254   : > { %1065 = vmatpush.bf16.msrb.mxu1 %v2713_v47 }
 0x2aa   : > { %v893_v27 = vpop.permute.xlu2 %892 }
 0x2ab   : > { %v899_v28 = vsel %vm894_vm14, %v893_v27, 0 }
 0x2ac   : > { %908 = vmatpush.bf16.xpose.msrb.mxu0 %v899_v28 }
 0x2b3   : > { %2461 = vmatmul.msk.bf16.vlgmr.msrb.gmra.mxu0 %vm894_vm14, %v888_v32 }
 0x330   : > { %v910_v33 = vpop.f32.mrf.mxu0 }
 0x331   : > { %v915_v34 = vsel %vm894_vm14, %v910_v33, -inf }
 0x332   : > { %916 = vmax.xlane.f32.xlu2 %v915_v34 }
 0x338   : > { %v912_v35 = vpop.f32.mrf.mxu0 }
 0x339   : > { %v918_v36 = vsel %vm894_vm14, %v912_v35, -inf }
 0x33a   : > { %919 = vmax.xlane.f32.xlu0 %v918_v36 }
 0x34a   : > { %1167 = vrot.lane.b32.xlu2 %v889_v25, %s3654_s25 }
 0x3a5   : > { %v917_v37 = vpop.xlane.xlu2 %916 }
 0x3a6   : > { %v921_v38 = vsub.f32 %v910_v33, %v917_v37 }
 0x3a8   : > { %v923_v39 = vmul.f32 1.442695, %v921_v38 }
 0x3aa   : > { %2825 = vpow2.f32 %v923_v39 }
 0x3ad   : > { %v920_v40 = vpop.xlane.xlu0 %919  ;;  %v1168_v54 = vpop.permute.xlu2 %1167 }
 0x3ae   : > { %v922_v41 = vsub.f32 %v912_v35, %v920_v40  ;;  %v1173_v56 = vsel %vm894_vm14, %v1168_v54, 0 }
 0x3b0   : > { %v2826_v42 = vpop.eup %2825  ;;  %v925_v43 = vmul.f32 1.442695, %v922_v41 }
 0x3b1   : > { %v927_v44 = vsel %vm894_vm14, %v2826_v42, 0.0 }
 0x3b2   : > { %2827 = vpow2.f32 %v925_v43  ;;  %928 = vadd.xlane.f32.xlu1 %v927_v44 }
 0x3b8   : > { %v2828_v45 = vpop.eup %2827 }
 0x3b9   : > { %v930_v46 = vsel %vm894_vm14, %v2828_v45, 0.0 }
 0x3ba   : > { %931 = vadd.xlane.f32.xlu0 %v930_v46 }
 0x3cb   : > { %959 = vrot.lane.b32.xlu1 %v889_v25, %s3650_s3  ;;  %s2360_s3 = scalar_lea.hbm %s3636_s22, %s3122_s4 }
 0x3ce   : > { %957 = vrot.lane.b32.xlu0 %v888_v32, %s3648_s30 }
 0x3d3   : > { %1074 = vrot.lane.b32.xlu1 %v889_v25, %s3653_s2 }
 0x3d6   : > { %1072 = vrot.lane.b32.xlu0 %v888_v32, %s3646_s0 }
 0x3db   : > { %1165 = vrot.lane.b32.xlu1 %v888_v32, %s3651_s1 }
 0x425   : > { %v929_v48 = vpop.xlane.xlu1 %928 }
 0x426   : > { %2829 = vrcp.f32 %v929_v48 }
 0x42c   : > { %v2830_v50 = vpop.eup %2829 }
 0x42d   : > { %v932_v49 = vpop.xlane.xlu0 %931  ;;  %v935_v52 = vmul.f32 %v2830_v50, %v2826_v42 }
 0x42e   : > { %2831 = vrcp.f32 %v932_v49 }
 0x434   : > { %v2832_v51 = vpop.eup %2831 }
 0x435   : > { %v936_v53 = vmul.f32 %v2832_v51, %v2828_v45 }
 0x437   : > { %v937_v55 = vpack.c.bf16 %v936_v53, %v935_v52 }
 0x439   : > { %2462 = vmatmul.msk.bf16.vlgmr.msra.gmra.mxu1 %vm894_vm14, %v937_v55 }
 0x43a   : > { %1182 = vmatpush.bf16.xpose.msra.mxu1 %v1173_v56 }
 0x43d   : > { %v960_v57 = vpop.permute.xlu1 %959 }
 0x43e   : > { %v965_v58 = vsel %vm894_vm14, %v960_v57, 0 }
 0x43f   : > { %974 = vmatpush.bf16.xpose.msrb.mxu2 %v965_v58 }
 0x440   : > { %v958_v59 = vpop.permute.xlu0 %957 }
 0x445   : > { %v1075_v60 = vpop.permute.xlu1 %1074 }
 0x446   : > { %v1080_v61 = vsel %vm894_vm14, %v1075_v60, 0  ;;  %2463 = vmatmul.msk.bf16.vlgmr.msrb.gmra.mxu2 %vm894_vm14, %v958_v59 }
 0x447   : > { %1089 = vmatpush.bf16.xpose.msra.mxu2 %v1080_v61 }
 0x448   : > { %v1073_v62 = vpop.permute.xlu0 %1072 }
 0x44d   : > { %v1166_v4 = vpop.permute.xlu1 %1165 }
 0x456   : > { %2475 = vmatmul.msk.bf16.vlgmr.msra.gmra.mxu2 %vm894_vm14, %v1073_v62 }
 0x4b6   : > { %v950_v63 = vpop.f32.mrf.mxu1 }
 0x4be   : > { %v952_v0 = vpop.f32.mrf.mxu1 }
 0x4bf   : > { %v955_v1 = vpack.c.bf16 %v952_v0, %v950_v63 }
 0x4c1   : > { %2474 = vmatmul.msk.bf16.vlgmr.msrb.gmra.mxu1 %vm894_vm14, %v955_v1 }
 0x4c9   : > { %v976_v2 = vpop.f32.mrf.mxu2 }
 0x4ca   : > { %v981_v3 = vsel %vm894_vm14, %v976_v2, -inf }
 0x4cb   : > { %982 = vmax.xlane.f32.xlu0 %v981_v3 }
 0x4d1   : > { %v978_v5 = vpop.f32.mrf.mxu2  ;;  %2482 = vmatmul.msk.bf16.vlgmr.msra.gmra.mxu1 %vm894_vm14, %v1166_v4 }
 0x4d2   : > { %v984_v6 = vsel %vm894_vm14, %v978_v5, -inf }
 0x4d3   : > { %985 = vmax.xlane.f32.xlu1 %v984_v6 }
 0x4d9   : > { %v1091_v7 = vpop.f32.mrf.mxu2 }
 0x4da   : > { %v1096_v8 = vsel %vm894_vm14, %v1091_v7, -inf }
 0x4db   : > { %1097 = vmax.xlane.f32.xlu1 %v1096_v8 }
 0x4e1   : > { %v1093_v33 = vpop.f32.mrf.mxu2 }
 0x4e2   : > { %v1099_v34 = vsel %vm894_vm14, %v1093_v33, -inf }
 0x53e   : > { %v3252_v9 = vpop.f32.mrf.mxu1  ;;  %v983_v10 = vpop.xlane.xlu0 %982 }
 0x53f   : > { %v987_v11 = vsub.f32 %v976_v2, %v983_v10 }
 0x541   : > { %v989_v16 = vmul.f32 1.442695, %v987_v11 }
 0x546   : > { %v3254_v12 = vpop.f32.mrf.mxu1  ;;  %v986_v13 = vpop.xlane.xlu1 %985 }
 0x547   : > { %v988_v14 = vsub.f32 %v978_v5, %v986_v13 }
 0x549   : > { %v991_v15 = vmul.f32 1.442695, %v988_v14 }
 0x54b   : > { %2833 = vpow2.f32 %v991_v15 }
 0x54c   : > { %2835 = vpow2.f32 %v989_v16  ;;  %v2716_v16 = vld [vmem:[%s3623_s9 + $0x18] sm:$0xff] }
 0x54e   : > { %v1184_v18 = vpop.f32.mrf.mxu1  ;;  %v1098_v19 = vpop.xlane.xlu1 %1097 }
 0x54f   : > { %v1102_v20 = vsub.f32 %v1091_v7, %v1098_v19  ;;  %v1189_v22 = vsel %vm894_vm14, %v1184_v18, -inf }
 0x550   : > { %1190 = vmax.xlane.f32.xlu2 %v1189_v22 }
 0x551   : > { %v2834_v23 = vpop.eup %2833  ;;  %v1104_v24 = vmul.f32 1.442695, %v1102_v20 }
 0x552   : > { %v996_v25 = vsel %vm894_vm14, %v2834_v23, 0.0  ;;  %v2836_v27 = vpop.eup %2835 }
 0x553   : > { %997 = vadd.xlane.f32.xlu1 %v996_v25  ;;  %2837 = vpow2.f32 %v1104_v24  ;;  %v993_v30 = vsel %vm894_vm14, %v2836_v27, 0.0 }
 0x556   : > { %v1186_v28 = vpop.f32.mrf.mxu1 }
 0x557   : > { %v1192_v29 = vsel %vm894_vm14, %v1186_v28, -inf }
 0x558   : > { %1193 = vmax.xlane.f32.xlu0 %v1192_v29  ;;  %994 = vadd.xlane.f32.xlu2 %v993_v30 }
 0x559   : > { %v3260_v32 = vpop.eup %2837 }
 0x55a   : > { %v1108_v35 = vsel %vm894_vm14, %v3260_v32, 0.0 }
 0x560   : > { %1100 = vmax.xlane.f32.xlu0 %v1099_v34  ;;  %1109 = vadd.xlane.f32.xlu2 %v1108_v35  ;;  %v2807_v35 = vld [vmem:[%s3624_s10] ss:$0 sm:$0xff] }
 0x574   : > { %1005 = vrot.lane.b32.xlu0 %v3222_v26, %s3648_s30  ;;  %s3683_s30 = smov 80  }
 0x57c   : > { %1212 = vrot.lane.b32.xlu0 %v3222_v26, %s3651_s1 }
 0x5c3   : > { %v1191_v36 = vpop.xlane.xlu2 %1190 }
 0x5c4   : > { %v1195_v37 = vsub.f32 %v1184_v18, %v1191_v36  ;;  %v2715_v18 = vld [vmem:[%s3623_s9 + $0x10] sm:$0xff] }
 0x5c6   : > { %v1197_v38 = vmul.f32 1.442695, %v1195_v37  ;;  %v998_v50 = vpop.xlane.xlu1 %997 }
 0x5c8   : > { %2839 = vpow2.f32 %v1197_v38 }
 0x5cb   : > { %v1194_v39 = vpop.xlane.xlu0 %1193  ;;  %v995_v49 = vpop.xlane.xlu2 %994 }
 0x5cc   : > { %v1196_v40 = vsub.f32 %v1186_v28, %v1194_v39 }
 0x5ce   : > { %v2840_v41 = vpop.eup %2839  ;;  %v1199_v42 = vmul.f32 1.442695, %v1196_v40 }
 0x5cf   : > { %v1201_v43 = vsel %vm894_vm14, %v2840_v41, 0.0 }
 0x5d0   : > { %2841 = vpow2.f32 %v1199_v42  ;;  %1202 = vadd.xlane.f32.xlu2 %v1201_v43 }
 0x5d3   : > { %v1101_v44 = vpop.xlane.xlu0 %1100  ;;  %v1110_v60 = vpop.xlane.xlu2 %1109 }
 0x5d4   : > { %v1103_v45 = vsub.f32 %v1093_v33, %v1101_v44 }
 0x5d6   : > { %v2842_v46 = vpop.eup %2841  ;;  %v1106_v47 = vmul.f32 1.442695, %v1103_v45 }
 0x5d7   : > { %v1204_v48 = vsel %vm894_vm14, %v2842_v46, 0.0 }
 0x5d8   : > { %2843 = vpow2.f32 %v1106_v47  ;;  %1205 = vadd.xlane.f32.xlu1 %v1204_v48 }
 0x5d9   : > { %2845 = vrcp.f32 %v995_v49 }
 0x5da   : > { %2847 = vrcp.f32 %v998_v50 }
 0x5de   : > { %v2844_v51 = vpop.eup %2843 }
 0x5df   : > { %v1111_v52 = vsel %vm894_vm14, %v2844_v51, 0.0  ;;  %v2846_v53 = vpop.eup %2845 }
 0x5e0   : > { %1112 = vadd.xlane.f32.xlu1 %v1111_v52  ;;  %v2848_v54 = vpop.eup %2847  ;;  %v1001_v55 = vmul.f32 %v2846_v53, %v2836_v27  ;;  %v2718_v53 = vld [vmem:[%s3627_s13 + $0x8] sm:$0xff] }
 0x5e1   : > { %v1002_v56 = vmul.f32 %v2848_v54, %v2834_v23 }
 0x5e3   : > { %v1003_v58 = vpack.c.bf16 %v1002_v56, %v1001_v55 }
 0x5e6   : > { %v1006_v57 = vpop.permute.xlu0 %1005 }
 0x5e7   : > { %1018 = vmatpush.bf16.msra.mxu3 %v1006_v57  ;;  %v2717_v57 = vld [vmem:[%s3627_s13] sm:$0xff] }
 0x5e8   : > { %1119 = vrot.lane.b32.xlu2 %v3222_v26, %s3646_s0  ;;  %v2714_v26 = vld [vmem:[%s3623_s9 + $0x8] sm:$0xff]  ;;  %s3681_s0 = smov 16  }
 0x5e9   : > { %1042 = vmatpush.bf16.msra.mxu0 %v2714_v26 }
 0x5ea   : > { %2464 = vmatmul.msk.bf16.vlgmr.msra.gmra.mxu3 %vm894_vm14, %v1003_v58 }
 0x5ed   : > { %1156 = vmatpush.bf16.msrb.mxu0 %v2715_v18 }
 0x5ee   : > { %v1213_v59 = vpop.permute.xlu0 %1212 }
 0x5ef   : > { %1225 = vmatpush.bf16.msrb.mxu2 %v1213_v59 }
 0x643   : > { %v1203_v61 = vpop.xlane.xlu2 %1202 }
 0x644   : > { %2849 = vrcp.f32 %v1203_v61 }
 0x64a   : > { %v2850_v0 = vpop.eup %2849 }
 0x64b   : > { %v1120_v62 = vpop.permute.xlu2 %1119  ;;  %v1206_v63 = vpop.xlane.xlu1 %1205  ;;  %v1209_v2 = vmul.f32 %v2850_v0, %v2840_v41 }
 0x64c   : > { %2851 = vrcp.f32 %v1206_v63  ;;  %1132 = vmatpush.bf16.msrb.mxu3 %v1120_v62 }
 0x64d   : > { %2853 = vrcp.f32 %v1110_v60 }
 0x650   : > { %1249 = vmatpush.bf16.msra.mxu3 %v2716_v16 }
 0x652   : > { %v2852_v1 = vpop.eup %2851 }
 0x653   : > { %v1210_v3 = vmul.f32 %v2852_v1, %v2842_v46  ;;  %v1113_v4 = vpop.xlane.xlu1 %1112  ;;  %v2854_v6 = vpop.eup %2853 }
 0x654   : > { %2855 = vrcp.f32 %v1113_v4  ;;  %v1116_v8 = vmul.f32 %v2854_v6, %v3260_v32 }
 0x655   : > { %v1211_v5 = vpack.c.bf16 %v1210_v3, %v1209_v2 }
 0x657   : > { %2483 = vmatmul.msk.bf16.vlgmr.msrb.gmra.mxu2 %vm894_vm14, %v1211_v5 }
 0x65a   : > { %v2856_v7 = vpop.eup %2855 }
 0x65b   : > { %v1117_v10 = vmul.f32 %v2856_v7, %v2844_v51 }
 0x65d   : > { %v1118_v11 = vpack.c.bf16 %v1117_v10, %v1116_v8  ;;  %v2808_v8 = vld [vmem:[%s3625_s11] ss:$0 sm:$0xff] }
 0x65f   : > { %2476 = vmatmul.msk.bf16.vlgmr.msrb.gmra.mxu3 %vm894_vm14, %v1118_v11 }
 0x66d   : > { %v1020_v13 = vpop.f32.mrf.mxu3 }
 0x675   : > { %v1022_v14 = vpop.f32.mrf.mxu3 }
 0x676   : > { %v1025_v15 = vpack.c.bf16 %v1022_v14, %v1020_v13  ;;  %v2809_v14 = vld [vmem:[%s3626_s12] ss:$0 sm:$0xff] }
 0x678   : > { %2469 = vmatmul.msk.bf16.vlgmr.msra.gmra.mxu0 %vm894_vm14, %v1025_v15 }
 0x679   : > { %1352 = vmatpush.bf16.msra.mxu0 %v2718_v53 }
 0x67d   : > { %1353 = vmatpush.bf16.msra.mxu0 %v2717_v57 }
 0x6da   : > { %v1227_v19 = vpop.f32.mrf.mxu2 }
 0x6e2   : > { %v1134_v20 = vpop.f32.mrf.mxu3  ;;  %v1229_v22 = vpop.f32.mrf.mxu2 }
 0x6e3   : > { %v1232_v23 = vpack.c.bf16 %v1229_v22, %v1227_v19 }
 0x6e5   : > { %2488 = vmatmul.msk.bf16.vlgmr.msra.gmra.mxu3 %vm894_vm14, %v1232_v23  ;;  %v2726_v23 = vld [vmem:[%s3629_s15 + $0x38] sm:$0xff] }
 0x6e6   : > { %1443 = vmatpush.bf16.msrb.mxu1 %v2726_v23 }
 0x6ea   : > { %v1136_v24 = vpop.f32.mrf.mxu3 }
 0x6eb   : > { %v1139_v25 = vpack.c.bf16 %v1136_v24, %v1134_v20  ;;  %v2725_v24 = vld [vmem:[%s3629_s15 + $0x30] sm:$0xff] }
 0x6ec   : > { %1444 = vmatpush.bf16.msrb.mxu1 %v2725_v24  ;;  %v2540_v24 = vld [vmem:[%s3622_s8 + $0x28] sm:$0xf0] }
 0x6ed   : > { %2481 = vmatmul.msk.bf16.vlgmr.msrb.gmra.mxu0 %vm894_vm14, %v1139_v25  ;;  %v2724_v25 = vld [vmem:[%s3629_s15 + $0x28] sm:$0xff] }
 0x6f0   : > { %1445 = vmatpush.bf16.msrb.mxu1 %v2724_v25 }
 0x6f5   : > { %v1044_v27 = vpop.f32.mrf.mxu0 }
 0x6f6   : > { %v1068_v29 = vadd.f32 %v3252_v9, %v1044_v27  ;;  %v2723_v27 = vld [vmem:[%s3629_s15 + $0x20] sm:$0xff] }
 0x6f7   : > { %1446 = vmatpush.bf16.msrb.mxu1 %v2723_v27 }
 0x6fd   : > { %v1046_v28 = vpop.f32.mrf.mxu0 }
 0x6fe   : > { %v1070_v37 = vadd.f32 %v3254_v12, %v1046_v28  ;;  %v2722_v28 = vld [vmem:[%s3629_s15 + $0x18] sm:$0xff] }
 0x6ff   : > { %1447 = vmatpush.bf16.msrb.mxu1 %v2722_v28 }
 0x768   : > { %v1251_v30 = vpop.f32.mrf.mxu3 }
 0x76a   : > { %v1158_v32 = vpop.f32.mrf.mxu0 }
 0x76b   : > { %v1163_v33 = vadd.f32 %v1158_v32, %v1068_v29  ;;  %v2721_v29 = vld [vmem:[%s3629_s15 + $0x10] sm:$0xff]  ;;  %v2810_v32 = vld [vmem:[%s3628_s14] ss:$0 sm:$0xff] }
 0x76c   : > { %1448 = vmatpush.bf16.msrb.mxu1 %v2721_v29 }
 0x76d   : > { %v1256_v34 = vadd.f32 %v1251_v30, %v1163_v33  ;;  %v2720_v30 = vld [vmem:[%s3629_s15 + $0x8] sm:$0xff] }
 0x76f   : > { %v1258_v36 = vadd.f32 %v1256_v34, %v3169_v17  ;;  %v2719_v34 = vld [vmem:[%s3629_s15] sm:$0xff] }
 0x770   : > { %v1253_v9 = vpop.f32.mrf.mxu3  ;;  %1449 = vmatpush.bf16.msrb.mxu1 %v2720_v30 }
 0x771   : > { %v3296_v38 = vadd.f32 %v2807_v35, %v1258_v36 }
 0x772   : > { %v1160_v39 = vpop.f32.mrf.mxu0 }
 0x773   : > { %v1164_v40 = vadd.f32 %v1160_v39, %v1070_v37  ;;  %v1268_v41 = vsel %vm760_vm6, %v3296_v38, 0.0 }
 0x774   : > { %1269 = vadd.xlane.f32.xlu1 %v1268_v41  ;;  %1450 = vmatpush.bf16.msrb.mxu1 %v2719_v34 }
 0x775   : > { %v1257_v42 = vadd.f32 %v1253_v9, %v1164_v40 }
 0x777   : > { %v1259_v43 = vadd.f32 %v1257_v42, %v3176_v21 }
 0x779   : > { %v3301_v44 = vadd.f32 %v2807_v35, %v1259_v43 }
 0x77b   : > { %v1271_v45 = vsel %vm760_vm6, %v3301_v44, 0.0 }
 0x77c   : > { %1272 = vadd.xlane.f32.xlu0 %v1271_v45 }
 0x7e7   : > { %v1270_v17 = vpop.xlane.xlu1 %1269 }
 0x7e8   : > { %v1274_v12 = vmul.f32 %v1270_v17, %v3180_v31 }
 0x7ea   : > { %v1276_v46 = vsub.f32 %v3296_v38, %v1274_v12 }
 0x7ec   : > { %v1278_v47 = vmul.f32 %v1276_v46, %v1276_v46 }
 0x7ee   : > { %v1280_v48 = vsel %vm760_vm6, %v1278_v47, 0.0 }
 0x7ef   : > { %1281 = vadd.xlane.f32.xlu1 %v1280_v48  ;;  %v1273_v49 = vpop.xlane.xlu0 %1272 }
 0x7f0   : > { %v1275_v50 = vmul.f32 %v1273_v49, %v3180_v31 }
 0x7f2   : > { %v1277_v21 = vsub.f32 %v3301_v44, %v1275_v50 }
 0x7f4   : > { %v1279_v51 = vmul.f32 %v1277_v21, %v1277_v21 }
 0x7f6   : > { %v1283_v52 = vsel %vm760_vm6, %v1279_v51, 0.0 }
 0x7f7   : > { %1284 = vadd.xlane.f32.xlu1 %v1283_v52 }
 0x862   : > { %v1282_v54 = vpop.xlane.xlu1 %1281 }
 0x863   : > { %v1286_v55 = vmul.f32 %v1282_v54, %v3180_v31 }
 0x865   : > { %v1288_v56 = vadd.f32 1e-05, %v1286_v55  ;;  %v2811_v55 = vld [vmem:[%s3630_s16] ss:$0 sm:$0xff] }
 0x867   : > { %2857 = vrsqrt.f32 %v1288_v56  ;;  %vm1296_vm0 = vweird.f32 %v1288_v56 }
 0x86a   : > { %v1285_v58 = vpop.xlane.xlu1 %1284 }
 0x86b   : > { %v1287_v59 = vmul.f32 %v1285_v58, %v3180_v31 }
 0x86d   : > { %v2858_v60 = vpop.eup %2857  ;;  %v1289_v61 = vadd.f32 1e-05, %v1287_v59 }
 0x86e   : > { %v1291_v62 = vmul.f32 %v2858_v60, %v1288_v56  ;;  %vm1297_vm15 = vweird.f32 %v2858_v60 }
 0x86f   : > { %2859 = vrsqrt.f32 %v1289_v61  ;;  %vm1298_vm1 = vmor %vm1296_vm0, %vm1297_vm15  ;;  %vm1306_vm3 = vweird.f32 %v1289_v61 }
 0x870   : > { %v1292_v63 = vmul.f32 %v2858_v60, %v1291_v62 }
 0x872   : > { %v1293_v0 = vmul.f32 0.5, %v1292_v63 }
 0x874   : > { %v1294_v1 = vsub.f32 1.5, %v1293_v0 }
 0x875   : > { %v2860_v2 = vpop.eup %2859 }
 0x876   : > { %v1295_v3 = vmul.f32 %v2858_v60, %v1294_v1  ;;  %v1301_v4 = vmul.f32 %v2860_v2, %v1289_v61  ;;  %vm1307_vm2 = vweird.f32 %v2860_v2 }
 0x877   : > { %vm1308_vm4 = vmor %vm1306_vm3, %vm1307_vm2 }
 0x878   : > { %v1302_v26 = vmul.f32 %v2860_v2, %v1301_v4  ;;  %v1299_v5 = vsel %vm1298_vm1, %v2858_v60, %v1295_v3 }
 0x879   : > { %v1310_v10 = vmul.f32 %v1299_v5, %v1276_v46 }
 0x87a   : > { %v1303_v6 = vmul.f32 0.5, %v1302_v26 }
 0x87b   : > { %v1315_v15 = vmul.f32 %v2808_v8, %v1310_v10  ;;  %v2729_v10 = vld [vmem:[%s3622_s8 + $0x34] sm:$0xf] }
 0x87c   : > { %v1304_v7 = vsub.f32 1.5, %v1303_v6 }
 0x87d   : > { %v1320_v19 = vadd.f32 %v2809_v14, %v1315_v15 }
 0x87e   : > { %v1305_v11 = vmul.f32 %v2860_v2, %v1304_v7  ;;  %v2546_v7 = vld [vmem:[%s3622_s8 + $0x30] sm:$0xf] }
 0x880   : > { %v1309_v13 = vsel %vm1308_vm4, %v2860_v2, %v1305_v11 }
 0x881   : > { %v1311_v16 = vmul.f32 %v1309_v13, %v1277_v21  ;;  %v2548_v13 = vld [vmem:[%s3622_s8 + $0x38] sm:$0xf0] }
 0x882   : > { %v2551_v15 = vor.u32 %v2729_v10, %v2548_v13 }
 0x883   : > { %v1316_v18 = vmul.f32 %v2808_v8, %v1311_v16  ;;  %v2730_v8 = vld [vmem:[%s3622_s8 + $0x34] sm:$0xf0] }
 0x884   : > { %v2547_v11 = vor.u32 %v2730_v8, %v2546_v7  ;;  %1572 = vmatpush.bf16.msrb.mxu3 %v2551_v15 }
 0x885   : > { %v1321_v20 = vadd.f32 %v2809_v14, %v1316_v18  ;;  %v2538_v18 = vld [vmem:[%s3622_s8 + $0x20] sm:$0xf] }
 0x886   : > { %1558 = vmatpush.bf16.msra.mxu2 %v2547_v11 }
 0x887   : > { %v1322_v22 = vpack.c.bf16 %v1321_v20, %v1320_v19  ;;  %v2728_v19 = vld [vmem:[%s3622_s8 + $0x24] sm:$0xf0]  ;;  %v2727_v20 = vld [vmem:[%s3622_s8 + $0x24] sm:$0xf] }
 0x888   : > { %v2539_v23 = vor.u32 %v2728_v19, %v2538_v18  ;;  %v2543_v25 = vor.u32 %v2727_v20, %v2540_v24 }
 0x889   : > { %2497 = vmatmul.msk.bf16.vlgmr.msra.gmra.mxu0 %vm760_vm6, %v1322_v22 }
 0x88a   : > { %1559 = vmatpush.bf16.msra.mxu2 %v2539_v23  ;;  %1573 = vmatpush.bf16.msrb.mxu3 %v2543_v25 }
 0x906   : > { %v1355_v33 = vpop.f32.mrf.mxu0 }
 0x907   : > { %v1356_v35 = vadd.f32 %v2810_v32, %v1355_v33 }
 0x909   : > { %v1360_v36 = vmul.f32 %v1356_v35, %v1356_v35 }
 0x90b   : > { %v1362_v37 = vmul.f32 %v1360_v36, %v1356_v35 }
 0x90d   : > { %v1364_v39 = vmul.f32 0.044715, %v1362_v37 }
 0x90e   : > { %v1357_v40 = vpop.f32.mrf.mxu0 }
 0x90f   : > { %v1366_v41 = vadd.f32 %v1364_v39, %v1356_v35  ;;  %v1358_v9 = vadd.f32 %v2810_v32, %v1357_v40 }
 0x911   : > { %v1368_v42 = vmul.f32 0.7978846, %v1366_v41  ;;  %v1361_v43 = vmul.f32 %v1358_v9, %v1358_v9 }
 0x913   : > { %v1363_v45 = vmul.f32 %v1361_v43, %v1358_v9  ;;  %2861 = vtanh.f32 %v1368_v42  ;;  %v2812_v43 = vld [vmem:[%s3679_s5 + $0x1] ss:$0 sm:$0xff] }
 0x915   : > { %v1365_v17 = vmul.f32 0.044715, %v1363_v45 }
 0x917   : > { %v1367_v12 = vadd.f32 %v1365_v17, %v1358_v9 }
 0x919   : > { %v1369_v46 = vmul.f32 0.7978846, %v1367_v12  ;;  %v2862_v47 = vpop.eup %2861 }
 0x91a   : > { %v1372_v48 = vadd.f32 1.0, %v2862_v47 }
 0x91b   : > { %2863 = vtanh.f32 %v1369_v46  ;;  %v2813_v46 = vld [vmem:[%s3680_s7 + $0x1] ss:$0 sm:$0xff] }
 0x91c   : > { %v1374_v50 = vmul.f32 0.5, %v1372_v48 }
 0x91e   : > { %v1376_v52 = vmul.f32 %v1374_v50, %v1356_v35 }
 0x921   : > { %v2864_v49 = vpop.eup %2863 }
 0x922   : > { %v1373_v21 = vadd.f32 1.0, %v2864_v49 }
 0x924   : > { %v1375_v51 = vmul.f32 0.5, %v1373_v21 }
 0x926   : > { %v1377_v53 = vmul.f32 %v1375_v51, %v1358_v9 }
 0x928   : > { %v1378_v54 = vpack.c.bf16 %v1377_v53, %v1376_v52 }
 0x92a   : > { %1451 = vmatmul.bf16.vlgmr.msrb.gmra.mxu1 %v1378_v54 }
 0x9a7   : > { %v1452_v56 = vpop.f32.mrf.mxu1 }
 0x9a8   : > { %v1457_v57 = vadd.f32 %v1452_v56, %v3296_v38 }
 0x9aa   : > { %v3357_v58 = vadd.f32 %v2811_v55, %v1457_v57 }
 0x9ac   : > { %v1469_v59 = vsel %vm760_vm6, %v3357_v58, 0.0 }
 0x9ad   : > { %1470 = vadd.xlane.f32.xlu2 %v1469_v59 }
 0x9af   : > { %v1454_v60 = vpop.f32.mrf.mxu1 }
 0x9b0   : > { %v1458_v61 = vadd.f32 %v1454_v60, %v3301_v44 }
 0x9b2   : > { %v3362_v62 = vadd.f32 %v2811_v55, %v1458_v61 }
 0x9b4   : > { %v1472_v63 = vsel %vm760_vm6, %v3362_v62, 0.0 }
 0x9b5   : > { %1473 = vadd.xlane.f32.xlu1 %v1472_v63 }
 0xa20   : > { %v1471_v0 = vpop.xlane.xlu2 %1470 }
 0xa21   : > { %v1475_v1 = vmul.f32 %v1471_v0, %v3180_v31 }
 0xa23   : > { %v1477_v38 = vsub.f32 %v3357_v58, %v1475_v1 }
 0xa25   : > { %v1479_v2 = vmul.f32 %v1477_v38, %v1477_v38 }
 0xa27   : > { %v1481_v3 = vsel %vm760_vm6, %v1479_v2, 0.0 }
 0xa28   : > { %1482 = vadd.xlane.f32.xlu1 %v1481_v3  ;;  %v1474_v4 = vpop.xlane.xlu1 %1473 }
 0xa29   : > { %v1476_v26 = vmul.f32 %v1474_v4, %v3180_v31 }
 0xa2b   : > { %v1478_v44 = vsub.f32 %v3362_v62, %v1476_v26 }
 0xa2d   : > { %v1480_v5 = vmul.f32 %v1478_v44, %v1478_v44 }
 0xa2f   : > { %v1484_v6 = vsel %vm760_vm6, %v1480_v5, 0.0 }
 0xa30   : > { %1485 = vadd.xlane.f32.xlu1 %v1484_v6 }
 0xa9b   : > { %v1483_v14 = vpop.xlane.xlu1 %1482 }
 0xa9c   : > { %v1487_v16 = vmul.f32 %v1483_v14, %v3180_v31  ;;  %v2731_v14 = vld [vmem:[%s3623_s9 + $0x20] sm:$0xff] }
 0xa9e   : > { %v1489_v22 = vadd.f32 1e-05, %v1487_v16 }
 0xaa0   : > { %2865 = vrsqrt.f32 %v1489_v22  ;;  %vm1497_vm7 = vweird.f32 %v1489_v22 }
 0xaa3   : > { %v1486_v27 = vpop.xlane.xlu1 %1485 }
 0xaa4   : > { %v1488_v28 = vmul.f32 %v1486_v27, %v3180_v31 }
 0xaa6   : > { %v2866_v29 = vpop.eup %2865  ;;  %v1490_v30 = vadd.f32 1e-05, %v1488_v28 }
 0xaa7   : > { %v1492_v32 = vmul.f32 %v2866_v29, %v1489_v22  ;;  %vm1498_vm5 = vweird.f32 %v2866_v29 }
 0xaa8   : > { %2867 = vrsqrt.f32 %v1490_v30  ;;  %vm1499_vm8 = vmor %vm1497_vm7, %vm1498_vm5  ;;  %vm1507_vm10 = vweird.f32 %v1490_v30  ;;  %vm2349_vm5 = vcmask 24576  }
 0xaa9   : > { %v1493_v33 = vmul.f32 %v2866_v29, %v1492_v32 }
 0xaab   : > { %v1494_v34 = vmul.f32 0.5, %v1493_v33 }
 0xaad   : > { %v1495_v35 = vsub.f32 1.5, %v1494_v34 }
 0xaae   : > { %v2868_v36 = vpop.eup %2867 }
 0xaaf   : > { %v1496_v37 = vmul.f32 %v2866_v29, %v1495_v35  ;;  %v1502_v39 = vmul.f32 %v2868_v36, %v1490_v30  ;;  %vm1508_vm9 = vweird.f32 %v2868_v36 }
 0xab0   : > { %vm1509_vm11 = vmor %vm1507_vm10, %vm1508_vm9 }
 0xab1   : > { %v1503_v40 = vmul.f32 %v2868_v36, %v1502_v39  ;;  %v1500_v41 = vsel %vm1499_vm8, %v2866_v29, %v1496_v37 }
 0xab2   : > { %v1511_v45 = vmul.f32 %v1500_v41, %v1477_v38 }
 0xab3   : > { %v1504_v9 = vmul.f32 0.5, %v1503_v40 }
 0xab4   : > { %v1516_v47 = vmul.f32 %v2812_v43, %v1511_v45 }
 0xab5   : > { %v1505_v42 = vsub.f32 1.5, %v1504_v9 }
 0xab6   : > { %v1521_v50 = vadd.f32 %v2813_v46, %v1516_v47 }
 0xab7   : > { %v1506_v17 = vmul.f32 %v2868_v36, %v1505_v42 }
 0xab9   : > { %v1510_v12 = vsel %vm1509_vm11, %v2868_v36, %v1506_v17 }
 0xaba   : > { %v1512_v48 = vmul.f32 %v1510_v12, %v1478_v44 }
 0xabc   : > { %v1517_v49 = vmul.f32 %v2812_v43, %v1512_v48 }
 0xabe   : > { %v1522_v21 = vadd.f32 %v2813_v46, %v1517_v49 }
 0xac0   : > { %v1523_v51 = vpack.c.bf16 %v1522_v21, %v1521_v50 }
 0xac2   : > { %2552 = vmatmul.msk.bf16.vlgmr.msra.gmra.mxu2 %vm760_vm6, %v1523_v51  ;;  %2553 = vmatmul.msk.bf16.vlgmr.msrb.gmra.mxu3 %vm760_vm6, %v1523_v51 }
 0xb45   : > { %v1561_v52 = vpop.f32.mrf.mxu2  ;;  %v1575_v53 = vpop.f32.mrf.mxu3 }
 0xb46   : > { %v1589_v60 = vmul.f32 0.25, %v1561_v52 }
 0xb4d   : > { %v1563_v54 = vpop.f32.mrf.mxu2  ;;  %v1577_v55 = vpop.f32.mrf.mxu3 }
 0xb4e   : > { %v1592_v56 = vpack.c.bf16 %v1563_v54, %v1561_v52  ;;  %v3406_v57 = vpack.c.bf16 %v1577_v55, %v1575_v53  ;;  %v1590_v59 = vmul.f32 0.25, %v1563_v54 }
 0xb50   : > { %1650 = vmatpush.bf16.msrb.mxu2 %v3406_v57  ;;  %1595 = vrot.lane.b32.xlu1 %v1592_v56, %s2979_s27  ;;  %v1591_v61 = vpack.c.bf16 %v1590_v59, %v1589_v60  ;;  %s3684_s27 = smov 48  }
 0xb54   : > { %1767 = vmatpush.bf16.msra.mxu2 %v2731_v14 }
 0xb58   : > { %1869 = vrot.lane.b32.xlu1 %v1592_v56, %s3681_s0 }
 0xb60   : > { %1776 = vrot.lane.b32.xlu1 %v1592_v56, %s3682_s26  ;;  %s2364_s26 = sshll.u32 %s2360_s3, 4  ;;  %s2365_s26 = int_to_ptr.hbm [resolvable:$true] %s2364_s26 }
 0xb68   : > { %1867 = vrot.lane.b32.xlu1 %v1591_v61, %s3683_s30 }
 0xbc2   : > { %v1596_v63 = vpop.permute.xlu1 %1595 }
 0xbc3   : > { %v1601_v0 = vsel %vm894_vm14, %v1596_v63, 0 }
 0xbc4   : > { %1610 = vmatpush.bf16.xpose.msrb.mxu0 %v1601_v0 }
 0xbca   : > { %v1870_v15 = vpop.permute.xlu1 %1869 }
 0xbcb   : > { %2562 = vmatmul.msk.bf16.vlgmr.msrb.gmra.mxu0 %vm894_vm14, %v1591_v61  ;;  %v1875_v30 = vsel %vm894_vm14, %v1870_v15, 0 }
 0xbd2   : > { %v1777_v18 = vpop.permute.xlu1 %1776 }
 0xbd3   : > { %v1782_v23 = vsel %vm894_vm14, %v1777_v18, 0 }
 0xbda   : > { %v1868_v43 = vpop.permute.xlu1 %1867 }
 0xc48   : > { %v1612_v1 = vpop.f32.mrf.mxu0 }
 0xc49   : > { %v1617_v38 = vsel %vm894_vm14, %v1612_v1, -inf }
 0xc4a   : > { %1618 = vmax.xlane.f32.xlu0 %v1617_v38 }
 0xc50   : > { %v1614_v2 = vpop.f32.mrf.mxu0 }
 0xc51   : > { %v1620_v3 = vsel %vm894_vm14, %v1614_v2, -inf }
 0xc52   : > { %1621 = vmax.xlane.f32.xlu0 %v1620_v3 }
 0xcbd   : > { %v1619_v4 = vpop.xlane.xlu0 %1618 }
 0xcbe   : > { %v1623_v26 = vsub.f32 %v1612_v1, %v1619_v4 }
 0xcc0   : > { %v1625_v44 = vmul.f32 1.442695, %v1623_v26 }
 0xcc2   : > { %2869 = vpow2.f32 %v1625_v44 }
 0xcc5   : > { %v1622_v5 = vpop.xlane.xlu0 %1621 }
 0xcc6   : > { %v1624_v6 = vsub.f32 %v1614_v2, %v1622_v5 }
 0xcc8   : > { %v2870_v7 = vpop.eup %2869  ;;  %v1627_v8 = vmul.f32 1.442695, %v1624_v6 }
 0xcc9   : > { %v1629_v10 = vsel %vm894_vm14, %v2870_v7, 0.0 }
 0xcca   : > { %2871 = vpow2.f32 %v1627_v8  ;;  %1630 = vadd.xlane.f32.xlu2 %v1629_v10 }
 0xcd0   : > { %v2872_v11 = vpop.eup %2871 }
 0xcd1   : > { %v1632_v13 = vsel %vm894_vm14, %v2872_v11, 0.0 }
 0xcd2   : > { %1633 = vadd.xlane.f32.xlu0 %v1632_v13 }
 0xce2   : > { %1661 = vrot.lane.b32.xlu2 %v1592_v56, %s3684_s27  ;;  %s2927_s27 = sshra.s32 %s2365_s26, 4  ;;  %s2928_s27 = int_to_ptr.hbm [resolvable:$true] %s2927_s27 }
 0xce3   : > { %s2929_s5 = scalar_lea.hbm %s2928_s27, 1  ;;  %p2934_p0 = scmp.lt.s32.totalorder %s2928_s27, %s3636_s22 }
 0xce4   : > { %p2930_p11 = scmp.ne.s32.totalorder %s2928_s27, %s2929_s5  ;;  %p2935_p1 = scmp.lt.s32.totalorder %s2933_s29, %s2929_s5 }
 0xce6   : > { %1659 = vrot.lane.b32.xlu0 %v1591_v61, %s3685_s23  ;;  %p2931_p12 = pnand %p2930_p11, %p3139_p5  ;;  %p2936_p2 = por %p2935_p1, %p2934_p0 }
 0xce8   : > { %p2932_p13 = pneg %p2931_p12 }
 0xcea   : > { %p2937_p3 = pnand %p2936_p2, %p2932_p13 }
 0xcee   : > { %1774 = vrot.lane.b32.xlu0 %v1591_v61, %s3686_s24 }
 0xd3d   : > { %v1631_v16 = vpop.xlane.xlu2 %1630 }
 0xd3e   : > { %2873 = vrcp.f32 %v1631_v16 }
 0xd44   : > { %v2874_v24 = vpop.eup %2873 }
 0xd45   : > { %v1662_v19 = vpop.permute.xlu2 %1661  ;;  %v1634_v20 = vpop.xlane.xlu0 %1633  ;;  %v1637_v27 = vmul.f32 %v2874_v24, %v2870_v7 }
 0xd46   : > { %v1667_v22 = vsel %vm894_vm14, %v1662_v19, 0  ;;  %2875 = vrcp.f32 %v1634_v20 }
 0xd47   : > { %1676 = vmatpush.bf16.xpose.msra.mxu3 %v1667_v22 }
 0xd4c   : > { %v2876_v25 = vpop.eup %2875 }
 0xd4d   : > { %v1638_v28 = vmul.f32 %v2876_v25, %v2872_v11 }
 0xd4f   : > { %1791 = vmatpush.bf16.xpose.msrb.mxu3 %v1782_v23  ;;  %v1639_v29 = vpack.c.bf16 %v1638_v28, %v1637_v27 }
 0xd51   : > { %2563 = vmatmul.msk.bf16.vlgmr.msrb.gmra.mxu2 %vm894_vm14, %v1639_v29 }
 0xd52   : > { %1884 = vmatpush.bf16.xpose.msrb.mxu2 %v1875_v30 }
 0xd58   : > { %v1660_v32 = vpop.permute.xlu0 %1659 }
 0xd59   : > { %2564 = vmatmul.msk.bf16.vlgmr.msra.gmra.mxu3 %vm894_vm14, %v1660_v32 }
 0xd60   : > { %v1775_v33 = vpop.permute.xlu0 %1774 }
 0xd69   : > { %2576 = vmatmul.msk.bf16.vlgmr.msrb.gmra.mxu3 %vm894_vm14, %v1775_v33  ;;  %v2732_v33 = vld [vmem:[%s3623_s9 + $0x28] sm:$0xff] }
 0xd6a   : > { %1744 = vmatpush.bf16.msra.mxu1 %v2732_v33 }
 0xdd4   : > { %v1652_v34 = vpop.f32.mrf.mxu2 }
 0xddc   : > { %v1654_v35 = vpop.f32.mrf.mxu2  ;;  %v1678_v36 = vpop.f32.mrf.mxu3 }
 0xddd   : > { %v1657_v37 = vpack.c.bf16 %v1654_v35, %v1652_v34  ;;  %v1683_v39 = vsel %vm894_vm14, %v1678_v36, -inf }
 0xdde   : > { %1684 = vmax.xlane.f32.xlu2 %v1683_v39 }
 0xddf   : > { %2575 = vmatmul.msk.bf16.vlgmr.msra.gmra.mxu2 %vm894_vm14, %v1657_v37 }
 0xde4   : > { %v1680_v40 = vpop.f32.mrf.mxu3 }
 0xde5   : > { %v1686_v41 = vsel %vm894_vm14, %v1680_v40, -inf }
 0xde6   : > { %1687 = vmax.xlane.f32.xlu1 %v1686_v41 }
 0xdec   : > { %v1793_v9 = vpop.f32.mrf.mxu3 }
 0xded   : > { %v1798_v42 = vsel %vm894_vm14, %v1793_v9, -inf }
 0xdee   : > { %1799 = vmax.xlane.f32.xlu1 %v1798_v42 }
 0xdef   : > { %2583 = vmatmul.msk.bf16.vlgmr.msrb.gmra.mxu2 %vm894_vm14, %v1868_v43 }
 0xdf4   : > { %v1795_v55 = vpop.f32.mrf.mxu3 }
 0xdf5   : > { %v1801_v61 = vsel %vm894_vm14, %v1795_v55, -inf }
 0xe51   : > { %v1685_v50 = vpop.xlane.xlu2 %1684 }
 0xe52   : > { %v1689_v21 = vsub.f32 %v1678_v36, %v1685_v50  ;;  %v2733_v50 = vld [vmem:[%s3623_s9 + $0x30] sm:$0xff] }
 0xe53   : > { %1858 = vmatpush.bf16.msrb.mxu1 %v2733_v50 }
 0xe54   : > { %v1691_v53 = vmul.f32 1.442695, %v1689_v21  ;;  %v2734_v21 = vld [vmem:[%s3623_s9 + $0x38] sm:$0xff] }
 0xe59   : > { %v1688_v45 = vpop.xlane.xlu1 %1687 }
 0xe5a   : > { %v1690_v17 = vsub.f32 %v1680_v40, %v1688_v45 }
 0xe5c   : > { %v1693_v12 = vmul.f32 1.442695, %v1690_v17 }
 0xe5e   : > { %2877 = vpow2.f32 %v1693_v12 }
 0xe5f   : > { %2879 = vpow2.f32 %v1691_v53 }
 0xe61   : > { %v1800_v54 = vpop.xlane.xlu1 %1799 }
 0xe62   : > { %v3436_v46 = vpop.f32.mrf.mxu2  ;;  %v1804_v56 = vsub.f32 %v1793_v9, %v1800_v54 }
 0xe64   : > { %v2878_v47 = vpop.eup %2877  ;;  %v1806_v63 = vmul.f32 1.442695, %v1804_v56 }
 0xe65   : > { %v1698_v48 = vsel %vm894_vm14, %v2878_v47, 0.0  ;;  %v2880_v0 = vpop.eup %2879 }
 0xe66   : > { %1699 = vadd.xlane.f32.xlu1 %v1698_v48  ;;  %2881 = vpow2.f32 %v1806_v63  ;;  %v1695_v1 = vsel %vm894_vm14, %v2880_v0, 0.0 }
 0xe6a   : > { %v3439_v49 = vpop.f32.mrf.mxu2 }
 0xe6c   : > { %v2882_v38 = vpop.eup %2881 }
 0xe6d   : > { %v1810_v2 = vsel %vm894_vm14, %v2882_v38, 0.0 }
 0xe72   : > { %v1886_v51 = vpop.f32.mrf.mxu2 }
 0xe73   : > { %v1891_v52 = vsel %vm894_vm14, %v1886_v51, -inf }
 0xe74   : > { %1892 = vmax.xlane.f32.xlu0 %v1891_v52 }
 0xe7a   : > { %v1888_v59 = vpop.f32.mrf.mxu2 }
 0xe7b   : > { %v1894_v60 = vsel %vm894_vm14, %v1888_v59, -inf }
 0xe7c   : > { %1895 = vmax.xlane.f32.xlu2 %v1894_v60  ;;  %1802 = vmax.xlane.f32.xlu0 %v1801_v61 }
 0xe84   : > { %1696 = vadd.xlane.f32.xlu2 %v1695_v1 }
 0xe8c   : > { %1811 = vadd.xlane.f32.xlu2 %v1810_v2  ;;  %v2814_v2 = vld [vmem:[%s3624_s10 + $0x1] ss:$0 sm:$0xff] }
 0xe90   : > { %1707 = vrot.lane.b32.xlu0 %v3406_v57, %s3685_s23  ;;  %s685_s23 = sand.u32 1, %s2967_s28  }
 0xe91   : > { %s686_s2 = scalar_lea.vmem [#allocation2], %s685_s23 }
 0xe92   : > { %s2362_s0 = sshll.u32 %s686_s2, 4  ;;  %s2363_s0 = int_to_ptr.vmem [resolvable:$true] %s2362_s0 }
 0xe98   : > { %1821 = vrot.lane.b32.xlu0 %v3406_v57, %s3686_s24 }
 0xed9   : > { %v1700_v13 = vpop.xlane.xlu1 %1699 }
 0xee7   : > { %v1893_v3 = vpop.xlane.xlu0 %1892 }
 0xee8   : > { %v1897_v4 = vsub.f32 %v1886_v51, %v1893_v3 }
 0xeea   : > { %v1899_v26 = vmul.f32 1.442695, %v1897_v4 }
 0xeec   : > { %2883 = vpow2.f32 %v1899_v26 }
 0xeef   : > { %v1896_v44 = vpop.xlane.xlu2 %1895  ;;  %v1803_v5 = vpop.xlane.xlu0 %1802 }
 0xef0   : > { %v1898_v6 = vsub.f32 %v1888_v59, %v1896_v44  ;;  %v1805_v10 = vsub.f32 %v1795_v55, %v1803_v5 }
 0xef2   : > { %v2884_v7 = vpop.eup %2883  ;;  %v1901_v8 = vmul.f32 1.442695, %v1898_v6  ;;  %v1808_v14 = vmul.f32 1.442695, %v1805_v10 }
 0xef3   : > { %v1903_v11 = vsel %vm894_vm14, %v2884_v7, 0.0 }
 0xef4   : > { %2885 = vpow2.f32 %v1901_v8  ;;  %1904 = vadd.xlane.f32.xlu2 %v1903_v11 }
 0xef7   : > { %v1697_v15 = vpop.xlane.xlu2 %1696 }
 0xef8   : > { %2887 = vrcp.f32 %v1697_v15 }
 0xef9   : > { %2889 = vrcp.f32 %v1700_v13 }
 0xefa   : > { %v2886_v16 = vpop.eup %2885  ;;  %2891 = vpow2.f32 %v1808_v14 }
 0xefb   : > { %v1906_v18 = vsel %vm894_vm14, %v2886_v16, 0.0 }
 0xefc   : > { %1907 = vadd.xlane.f32.xlu1 %v1906_v18 }
 0xefe   : > { %v2888_v19 = vpop.eup %2887 }
 0xeff   : > { %v2890_v20 = vpop.eup %2889  ;;  %v1703_v23 = vmul.f32 %v2888_v19, %v2880_v0  ;;  %v1812_v30 = vpop.xlane.xlu2 %1811 }
 0xf00   : > { %v2892_v22 = vpop.eup %2891  ;;  %v1704_v24 = vmul.f32 %v2890_v20, %v2878_v47 }
 0xf01   : > { %v1813_v27 = vsel %vm894_vm14, %v2892_v22, 0.0 }
 0xf02   : > { %v1708_v25 = vpop.permute.xlu0 %1707  ;;  %v1705_v28 = vpack.c.bf16 %v1704_v24, %v1703_v23 }
 0xf03   : > { %1720 = vmatpush.bf16.msra.mxu0 %v1708_v25 }
 0xf04   : > { %1814 = vadd.xlane.f32.xlu1 %v1813_v27  ;;  %v2735_v27 = vld [vmem:[%s3627_s13 + $0x10] sm:$0xff] }
 0xf06   : > { %2565 = vmatmul.msk.bf16.vlgmr.msra.gmra.mxu0 %vm894_vm14, %v1705_v28 }
 0xf0a   : > { %v1822_v29 = vpop.permute.xlu0 %1821 }
 0xf0b   : > { %1834 = vmatpush.bf16.msrb.mxu0 %v1822_v29 }
 0xf0c   : > { %1914 = vrot.lane.b32.xlu2 %v3406_v57, %s3683_s30  ;;  %s2352_s30 = scalar_lea.sflag [#allocation3], %s685_s23 }
 0xf0f   : > { %1951 = vmatpush.bf16.msra.mxu0 %v2734_v21 }
 0xf67   : > { %v1905_v32 = vpop.xlane.xlu2 %1904 }
 0xf68   : > { %2893 = vrcp.f32 %v1905_v32 }
 0xf6e   : > { %v2894_v36 = vpop.eup %2893 }
 0xf6f   : > { %v1908_v34 = vpop.xlane.xlu1 %1907  ;;  %v1915_v35 = vpop.permute.xlu2 %1914  ;;  %v1911_v39 = vmul.f32 %v2894_v36, %v2884_v7 }
 0xf70   : > { %2895 = vrcp.f32 %v1908_v34  ;;  %1927 = vmatpush.bf16.msra.mxu3 %v1915_v35 }
 0xf71   : > { %2897 = vrcp.f32 %v1812_v30 }
 0xf76   : > { %v2896_v37 = vpop.eup %2895 }
 0xf77   : > { %v1912_v40 = vmul.f32 %v2896_v37, %v2886_v16  ;;  %v1815_v41 = vpop.xlane.xlu1 %1814  ;;  %v2898_v9 = vpop.eup %2897 }
 0xf78   : > { %2899 = vrcp.f32 %v1815_v41  ;;  %v1818_v43 = vmul.f32 %v2898_v9, %v2882_v38 }
 0xf79   : > { %v1913_v57 = vpack.c.bf16 %v1912_v40, %v1911_v39 }
 0xf7b   : > { %2584 = vmatmul.msk.bf16.vlgmr.msra.gmra.mxu3 %vm894_vm14, %v1913_v57 }
 0xf7e   : > { %v2900_v42 = vpop.eup %2899 }
 0xf7f   : > { %v1819_v45 = vmul.f32 %v2900_v42, %v2892_v22  ;;  %v2736_v22 = vld [vmem:[%s3627_s13 + $0x18] sm:$0xff] }
 0xf81   : > { %v1820_v17 = vpack.c.bf16 %v1819_v45, %v1818_v43 }
 0xf83   : > { %v1722_v12 = vpop.f32.mrf.mxu0  ;;  %2577 = vmatmul.msk.bf16.vlgmr.msrb.gmra.mxu0 %vm894_vm14, %v1820_v17 }
 0xf8b   : > { %v1724_v47 = vpop.f32.mrf.mxu0 }
 0xf8c   : > { %v1727_v48 = vpack.c.bf16 %v1724_v47, %v1722_v12  ;;  %v2816_v12 = vld [vmem:[%s3626_s12 + $0x1] ss:$0 sm:$0xff] }
 0xf8e   : > { %2570 = vmatmul.msk.bf16.vlgmr.msra.gmra.mxu1 %vm894_vm14, %v1727_v48 }
 0xf8f   : > { %2059 = vmatpush.bf16.msra.mxu1 %v2736_v22 }
 0xf93   : > { %2060 = vmatpush.bf16.msra.mxu1 %v2735_v27  ;;  %v2747_v27 = vld [vmem:[%s3632_s18] sm:$0xff] }
 0xffe   : > { %v1929_v51 = vpop.f32.mrf.mxu3 }
0x1000   : > { %v1836_v52 = vpop.f32.mrf.mxu0 }
0x1006   : > { %v1931_v53 = vpop.f32.mrf.mxu3 }
0x1007   : > { %v1934_v54 = vpack.c.bf16 %v1931_v53, %v1929_v51  ;;  %v2744_v53 = vld [vmem:[%s3629_s15 + $0x78] sm:$0xff] }
0x1008   : > { %v1838_v55 = vpop.f32.mrf.mxu0  ;;  %2151 = vmatpush.bf16.msra.mxu2 %v2744_v53 }
0x1009   : > { %v1841_v56 = vpack.c.bf16 %v1838_v55, %v1836_v52  ;;  %2589 = vmatmul.msk.bf16.vlgmr.msra.gmra.mxu0 %vm894_vm14, %v1934_v54  ;;  %v2743_v54 = vld [vmem:[%s3629_s15 + $0x70] sm:$0xff]  ;;  %v2742_v55 = vld [vmem:[%s3629_s15 + $0x68] sm:$0xff] }
0x100b   : > { %2582 = vmatmul.msk.bf16.vlgmr.msrb.gmra.mxu1 %vm894_vm14, %v1841_v56  ;;  %v1746_v59 = vpop.f32.mrf.mxu1  ;;  %v2741_v56 = vld [vmem:[%s3629_s15 + $0x60] sm:$0xff] }
0x100c   : > { %v1770_v61 = vadd.f32 %v3436_v46, %v1746_v59  ;;  %2152 = vmatpush.bf16.msra.mxu2 %v2743_v54  ;;  %v2740_v59 = vld [vmem:[%s3629_s15 + $0x58] sm:$0xff] }
0x1010   : > { %2153 = vmatpush.bf16.msra.mxu2 %v2742_v55 }
0x1013   : > { %v1748_v60 = vpop.f32.mrf.mxu1 }
0x1014   : > { %v1772_v4 = vadd.f32 %v3439_v49, %v1748_v60  ;;  %2154 = vmatpush.bf16.msra.mxu2 %v2741_v56  ;;  %v2739_v60 = vld [vmem:[%s3629_s15 + $0x50] sm:$0xff] }
0x1018   : > { %2155 = vmatpush.bf16.msra.mxu2 %v2740_v59 }
0x101c   : > { %2156 = vmatpush.bf16.msra.mxu2 %v2739_v60 }
0x1086   : > { %v1953_v63 = vpop.f32.mrf.mxu0 }
0x1088   : > { %v1860_v0 = vpop.f32.mrf.mxu1 }
0x1089   : > { %v1865_v1 = vadd.f32 %v1860_v0, %v1770_v61  ;;  %v2738_v61 = vld [vmem:[%s3629_s15 + $0x48] sm:$0xff] }
0x108a   : > { %2157 = vmatpush.bf16.msra.mxu2 %v2738_v61 }
0x108b   : > { %v1958_v38 = vadd.f32 %v1953_v63, %v1865_v1  ;;  %v2817_v63 = vld [vmem:[%s3628_s14 + $0x1] ss:$0 sm:$0xff] }
0x108c   : > { %v2737_v1 = vld [vmem:[%s3629_s15 + $0x40] sm:$0xff] }
0x108d   : > { %v1960_v3 = vadd.f32 %v1958_v38, %v3357_v58 }
0x108e   : > { %v1955_v46 = vpop.f32.mrf.mxu0  ;;  %2158 = vmatpush.bf16.msra.mxu2 %v2737_v1 }
0x108f   : > { %v3476_v26 = vadd.f32 %v2814_v2, %v1960_v3 }
0x1090   : > { %v1862_v44 = vpop.f32.mrf.mxu1 }
0x1091   : > { %v1866_v5 = vadd.f32 %v1862_v44, %v1772_v4  ;;  %v1973_v6 = vsel %vm760_vm6, %v3476_v26, 0.0 }
0x1092   : > { %1974 = vadd.xlane.f32.xlu1 %v1973_v6 }
0x1093   : > { %v1959_v7 = vadd.f32 %v1955_v46, %v1866_v5 }
0x1095   : > { %v1961_v8 = vadd.f32 %v1959_v7, %v3362_v62 }
0x1097   : > { %v3481_v10 = vadd.f32 %v2814_v2, %v1961_v8 }
0x1099   : > { %v1976_v11 = vsel %vm760_vm6, %v3481_v10, 0.0 }
0x109a   : > { %1977 = vadd.xlane.f32.xlu0 %v1976_v11 }
0x1105   : > { %v1975_v58 = vpop.xlane.xlu1 %1974 }
0x1106   : > { %v1979_v49 = vmul.f32 %v1975_v58, %v3180_v31 }
0x1108   : > { %v1981_v13 = vsub.f32 %v3476_v26, %v1979_v49 }
0x110a   : > { %v1983_v14 = vmul.f32 %v1981_v13, %v1981_v13 }
0x110c   : > { %v1985_v15 = vsel %vm760_vm6, %v1983_v14, 0.0 }
0x110d   : > { %1986 = vadd.xlane.f32.xlu1 %v1985_v15  ;;  %v1978_v16 = vpop.xlane.xlu0 %1977 }
0x110e   : > { %v1980_v18 = vmul.f32 %v1978_v16, %v3180_v31 }
0x1110   : > { %v1982_v62 = vsub.f32 %v3481_v10, %v1980_v18 }
0x1112   : > { %v1984_v19 = vmul.f32 %v1982_v62, %v1982_v62 }
0x1114   : > { %v1988_v20 = vsel %vm760_vm6, %v1984_v19, 0.0 }
0x1115   : > { %1989 = vadd.xlane.f32.xlu1 %v1988_v20 }
0x1180   : > { %v1987_v23 = vpop.xlane.xlu1 %1986 }
0x1181   : > { %v1991_v24 = vmul.f32 %v1987_v23, %v3180_v31  ;;  %v2746_v23 = vld [vmem:[%s3631_s17 + $0x8] sm:$0xff] }
0x1182   : > { %2241 = vmatpush.bf16.msrb.mxu0 %v2746_v23 }
0x1183   : > { %v1993_v25 = vadd.f32 1e-05, %v1991_v24  ;;  %v2745_v24 = vld [vmem:[%s3631_s17] sm:$0xff] }
0x1185   : > { %2901 = vrsqrt.f32 %v1993_v25  ;;  %vm2001_vm13 = vweird.f32 %v1993_v25 }
0x1186   : > { %2242 = vmatpush.bf16.msrb.mxu0 %v2745_v24 }
0x1188   : > { %v1990_v28 = vpop.xlane.xlu1 %1989 }
0x1189   : > { %v1992_v29 = vmul.f32 %v1990_v28, %v3180_v31  ;;  %v2815_v31 = vld [vmem:[%s3625_s11 + $0x1] ss:$0 sm:$0xff] }
0x118a   : > { %v2818_v28 = vld [vmem:[%s3630_s16 + $0x1] ss:$0 sm:$0xff] }
0x118b   : > { %v2902_v30 = vpop.eup %2901  ;;  %v1994_v32 = vadd.f32 1e-05, %v1992_v29 }
0x118c   : > { %v1996_v33 = vmul.f32 %v2902_v30, %v1993_v25  ;;  %vm2002_vm12 = vweird.f32 %v2902_v30  ;;  %v2748_v25 = vld [vmem:[%s3632_s18 + $0x8] sm:$0xff] }
0x118d   : > { %2903 = vrsqrt.f32 %v1994_v32  ;;  %vm2003_vm14 = vmor %vm2001_vm13, %vm2002_vm12  ;;  %vm2011_vm0 = vweird.f32 %v1994_v32  ;;  %2209 = vmatpush.bf16.msrb.mxu3 %v2748_v25 }
0x118e   : > { %v1997_v34 = vmul.f32 %v2902_v30, %v1996_v33 }
0x1190   : > { %v1998_v35 = vmul.f32 0.5, %v1997_v34 }
0x1191   : > { %2210 = vmatpush.bf16.msrb.mxu3 %v2747_v27 }
0x1192   : > { %v1999_v36 = vsub.f32 1.5, %v1998_v35 }
0x1193   : > { %v2904_v37 = vpop.eup %2903 }
0x1194   : > { %v2000_v39 = vmul.f32 %v2902_v30, %v1999_v36  ;;  %v2006_v40 = vmul.f32 %v2904_v37, %v1994_v32  ;;  %vm2012_vm15 = vweird.f32 %v2904_v37 }
0x1195   : > { %vm2013_vm1 = vmor %vm2011_vm0, %vm2012_vm15 }
0x1196   : > { %v2007_v41 = vmul.f32 %v2904_v37, %v2006_v40  ;;  %v2004_v57 = vsel %vm2003_vm14, %v2902_v30, %v2000_v39 }
0x1197   : > { %v2015_v43 = vmul.f32 %v2004_v57, %v1981_v13 }
0x1198   : > { %v2008_v9 = vmul.f32 0.5, %v2007_v41 }
0x1199   : > { %v2020_v47 = vmul.f32 %v2815_v31, %v2015_v43  ;;  %v2752_v43 = vld [vmem:[%s3634_s20 + $0x18] sm:$0xff] }
0x119a   : > { %v2009_v42 = vsub.f32 1.5, %v2008_v9  ;;  %v2756_v9 = vld [vmem:[%s3634_s20 + $0x38] sm:$0xff] }
0x119b   : > { %v2025_v21 = vadd.f32 %v2816_v12, %v2020_v47  ;;  %2336 = vmatpush.bf16.msrb.mxu1 %v2756_v9 }
0x119c   : > { %v2010_v45 = vmul.f32 %v2904_v37, %v2009_v42 }
0x119e   : > { %v2014_v17 = vsel %vm2013_vm1, %v2904_v37, %v2010_v45 }
0x119f   : > { %v2016_v48 = vmul.f32 %v2014_v17, %v1982_v62  ;;  %v2751_v17 = vld [vmem:[%s3634_s20 + $0x10] sm:$0xff] }
0x11a1   : > { %v2021_v50 = vmul.f32 %v2815_v31, %v2016_v48  ;;  %v2753_v31 = vld [vmem:[%s3634_s20 + $0x20] sm:$0xff] }
0x11a2   : > { %v2248_v48 = vld [vmem:[%s3633_s19] sm:$0x1] }
0x11a3   : > { %v2026_v51 = vadd.f32 %v2816_v12, %v2021_v50  ;;  %v2750_v12 = vld [vmem:[%s3634_s20 + $0x8] sm:$0xff] }
0x11a5   : > { %v2027_v52 = vpack.c.bf16 %v2026_v51, %v2025_v21  ;;  %v2749_v51 = vld [vmem:[%s3634_s20] sm:$0xff] }
0x11a7   : > { %2606 = vmatmul.msk.bf16.vlgmr.msra.gmra.mxu1 %vm760_vm6, %v2027_v52 }
0x1224   : > { %v2062_v0 = vpop.f32.mrf.mxu1 }
0x1225   : > { %v2063_v38 = vadd.f32 %v2817_v63, %v2062_v0 }
0x1227   : > { %v2067_v2 = vmul.f32 %v2063_v38, %v2063_v38 }
0x1229   : > { %v2069_v3 = vmul.f32 %v2067_v2, %v2063_v38 }
0x122b   : > { %v2071_v4 = vmul.f32 0.044715, %v2069_v3 }
0x122c   : > { %v2064_v44 = vpop.f32.mrf.mxu1 }
0x122d   : > { %v2073_v5 = vadd.f32 %v2071_v4, %v2063_v38  ;;  %v2065_v6 = vadd.f32 %v2817_v63, %v2064_v44 }
0x122f   : > { %v2075_v46 = vmul.f32 0.7978846, %v2073_v5  ;;  %v2068_v7 = vmul.f32 %v2065_v6, %v2065_v6 }
0x1231   : > { %v2070_v8 = vmul.f32 %v2068_v7, %v2065_v6  ;;  %2905 = vtanh.f32 %v2075_v46 }
0x1233   : > { %v2072_v11 = vmul.f32 0.044715, %v2070_v8 }
0x1235   : > { %v2074_v58 = vadd.f32 %v2072_v11, %v2065_v6 }
0x1237   : > { %v2076_v49 = vmul.f32 0.7978846, %v2074_v58  ;;  %v2906_v13 = vpop.eup %2905 }
0x1238   : > { %v2079_v14 = vadd.f32 1.0, %v2906_v13 }
0x1239   : > { %2907 = vtanh.f32 %v2076_v49 }
0x123a   : > { %v2081_v16 = vmul.f32 0.5, %v2079_v14 }
0x123c   : > { %v2083_v19 = vmul.f32 %v2081_v16, %v2063_v38 }
0x123f   : > { %v2908_v15 = vpop.eup %2907 }
0x1240   : > { %v2080_v18 = vadd.f32 1.0, %v2908_v15 }
0x1242   : > { %v2082_v62 = vmul.f32 0.5, %v2080_v18 }
0x1244   : > { %v2084_v20 = vmul.f32 %v2082_v62, %v2065_v6  ;;  %v2287_v6 = vld [vmem:[%s3635_s21] sm:$0x1] }
0x1246   : > { %v2085_v22 = vpack.c.bf16 %v2084_v20, %v2083_v19 }
0x1248   : > { %2159 = vmatmul.bf16.vlgmr.msra.gmra.mxu2 %v2085_v22 }
0x12cb   : > { %v2160_v29 = vpop.f32.mrf.mxu2 }
0x12cc   : > { %v2165_v30 = vadd.f32 %v2160_v29, %v3476_v26  ;;  %v2755_v26 = vld [vmem:[%s3634_s20 + $0x30] sm:$0xff] }
0x12cd   : > { %2337 = vmatpush.bf16.msrb.mxu1 %v2755_v26 }
0x12ce   : > { %v2172_v32 = vadd.f32 %v2818_v28, %v2165_v30 }
0x12d0   : > { %v2174_v33 = vpack.c.bf16 %v2172_v32, %v2172_v32 }
0x12d2   : > { %v2217_v34 = vshrl.u32 %v2174_v33, 16 }
0x12d3   : > { %v2162_v35 = vpop.f32.mrf.mxu2 }
0x12d4   : > { %v2219_v36 = vrot.slane %v2217_v34, 3  ;;  %v2166_v37 = vadd.f32 %v2162_v35, %v3481_v10  ;;  %v2754_v10 = vld [vmem:[%s3634_s20 + $0x28] sm:$0xff] }
0x12d5   : > { %2338 = vmatpush.bf16.msrb.mxu1 %v2754_v10 }
0x12d6   : > { %v2173_v39 = vadd.f32 %v2818_v28, %v2166_v37  ;;  %2673 = vmatmul.msk.bf16.vlgmr.msrb.gmra.mxu0 %vm760_vm6, %v2219_v36 }
0x12d8   : > { %v2179_v40 = vpack.c.bf16 %v2173_v39, %v2173_v39 }
0x12d9   : > { %2339 = vmatpush.bf16.msrb.mxu1 %v2753_v31 }
0x12da   : > { %v2185_v41 = vshrl.u32 %v2179_v40, 16 }
0x12dc   : > { %v2187_v57 = vrot.slane %v2185_v41, 3 }
0x12dd   : > { %2340 = vmatpush.bf16.msrb.mxu1 %v2752_v43 }
0x12de   : > { %2664 = vmatmul.msk.bf16.vlgmr.msrb.gmra.mxu3 %vm760_vm6, %v2187_v57 }
0x12e1   : > { %2341 = vmatpush.bf16.msrb.mxu1 %v2751_v17 }
0x12e5   : > { %2342 = vmatpush.bf16.msrb.mxu1 %v2750_v12 }
0x12e9   : > { %2343 = vmatpush.bf16.msrb.mxu1 %v2749_v51 }
0x1353   : > { %v2244_v42 = vpop.f32.mrf.mxu0 }
0x135b   : > { %v2246_v45 = vpop.f32.mrf.mxu0 }
0x1361   : > { %v2212_v47 = vpop.f32.mrf.mxu3 }
0x1362   : > { %v2245_v50 = vadd.f32 %v2244_v42, %v2212_v47 }
0x1364   : > { %v2249_v21 = vadd.f32 %v2248_v48, %v2245_v50 }
0x1366   : > { %v2250_v52 = vsub.f32 0.0, %v2249_v21 }
0x1368   : > { %v2251_v53 = vmul.f32 1.442695, %v2250_v52 }
0x1369   : > { %v2214_v54 = vpop.f32.mrf.mxu3 }
0x136a   : > { %2909 = vpow2.f32 %v2251_v53 }
0x1370   : > { %v2910_v55 = vpop.eup %2909 }
0x1371   : > { %v2253_v56 = vadd.f32 1.0, %v2910_v55 }
0x1373   : > { %2911 = vrcp.f32 %v2253_v56  ;;  %v2265_v63 = vand.u32 2147483648, %v2253_v56  ;;  %v2263_v1 = vand.u32 2147483647, %v2253_v56  ;;  %vm2259_vm2 = vweird.f32 %v2253_v56 }
0x1375   : > { %v2266_v2 = vor.u32 1.1754944e-38, %v2265_v63  ;;  %vm2264_vm4 = vcmp.eq.f32.partialorder %v2263_v1, 8.507059e+37 }
0x1379   : > { %v2912_v59 = vpop.eup %2911 }
0x137a   : > { %v2255_v60 = vmul.f32 %v2912_v59, %v2253_v56  ;;  %vm2260_vm6 = vweird.f32 %v2912_v59 }
0x137b   : > { %vm2261_vm3 = vmor %vm2259_vm2, %vm2260_vm6 }
0x137c   : > { %v2256_v61 = vsub.f32 1.0, %v2255_v60 }
0x137e   : > { %v2257_v0 = vmul.f32 %v2912_v59, %v2256_v61 }
0x1380   : > { %v2258_v38 = vadd.f32 %v2912_v59, %v2257_v0 }
0x1382   : > { %v2262_v3 = vsel %vm2261_vm3, %v2912_v59, %v2258_v38 }
0x1383   : > { %v2267_v4 = vsel %vm2264_vm4, %v2266_v2, %v2262_v3 }
0x1384   : > { %v2269_v44 = vmul.f32 %v2267_v4, %v2249_v21 }
0x1386   : > { %v2270_v5 = vpack.c.bf16 %v2269_v44, %v2269_v44 }
0x1388   : > { %2344 = vmatmul.bf16.vlgmr.msrb.gmra.mxu1 %v2270_v5 }
0x1405   : > { %v2345_v46 = vpop.f32.mrf.mxu1 }
0x1406   : > { %v2346_v7 = vadd.f32 %v2345_v46, %v2287_v6 }
0x1408   : > { %2350 = vst.msk [vmem:[%s686_s2] sm:$0x1] %vm2349_vm5, %v2346_v7 }
0x1409   : > { %2940 = shalt.err (!%p2937_p3)
}
0x140a   : > { %2757 = dma.vmem_to_hbm [thread:$0]  (%p3139_p5), %s2363_s0, 16, %s2365_s26, %s2352_s30  }
0x140d   : > { %v2347_v8 = vpop.f32.mrf.mxu1 }
0x140e PF: > { %s3687_s23 = sld [smem:[#allocation7_spill]] }
0x140f   : > { %s3688_s25 = sld [smem:[#allocation5_spill]] }
0x1414   : > { %p2763_p4 = scmp.ge.s32.totalorder %s3687_s23, 2 }
0x1415   : > { %s2376_s7 = sand.u32 1, %s3688_s25  }
0x1416   : > { %p2760_p7 = pnand %p2763_p4, %p3143_p6  ;;  %s2377_s4 = scalar_lea.sflag [#allocation3], %s2376_s7 }
0x1418   : > { %p2761_p8 = pneg %p2760_p7 }
0x141a   : > { %2958 = dma.done.wait (%p2761_p8), %s2377_s4, 16  }
0x141b   : > { %2960 = vsyncadd (%p2761_p8), %s2377_s4, 4294967280  ;;  %s3690_s30 = sld [smem:[#allocation8_spill]]  ;;  %s3693_s3 = smov %s2967_s28 }
0x141c   : > { %s3691_s5 = sld [smem:[#allocation6_spill]] }
0x141d   : > { %s3692_s29 = sld [smem:[#allocation9_spill]] }
0x1421   : > { %p32_p9 = scmp.ge.s32.totalorder %s3690_s30, 4  }
0x1422   : > { %s3694_s28 = smov %s3691_s5 }
0x1423   :  { %34 = sbr.rel (!%p32_p9) target bundleno = 12 (0xc), region = 157 }
0x1428   :  { %2382 = vsyncpa [#allocation3], 1 }
0x1429   :  { %2384 = vsyncpa [#allocation3 + $0x1], 1 }

</bundles_post_ra>
